<compile_context>
chip_gen: v5e
topology: v5e:2x2
jax: 0.10.0
libtpu: 0.0.40
codegen_flags: <defaults>
</compile_context>

<pallas_src>
import numpy as np

import jax
import jax.numpy as jnp
from jax.experimental import pallas as pl
from jax.experimental.pallas import tpu as pltpu


# (kernel_size, stride) for conv1..conv3 -- fixed by the PyTorch module.
_CONV_CFG = ((8, 4), (4, 2), (3, 1))


# ---------------------------------------------------------------------------
# Fused Pallas kernel: whole forward pass for ONE sample per grid step.
# ---------------------------------------------------------------------------
def fused_vpg_kernel(p1_ref, w1_ref, b1_ref,
                     s2_ref, w2_ref, b2_ref,
                     s3_ref, w3_ref, b3_ref,
                     wfc_ref, bfc_ref, wl_ref, bl_ref,
                     o_ref):
    def dot(a, b):
        return jnp.dot(a, b, preferred_element_type=jnp.float32)

    # conv1: precomputed im2col patches @ W1 + b1, ReLU.        (OH1*OW1, 32)
    a1 = jnp.maximum(dot(p1_ref[0], w1_ref[...]) + b1_ref[...], 0.0)

    # conv2 / conv3 as a sum over kernel offsets k of  S_k @ act @ W_k.
    def conv_by_offsets(act, s_ref, w_ref, b_ref):
        acc = dot(dot(s_ref[0], act), w_ref[0])
        for k in range(1, s_ref.shape[0]):           # static unroll (<=16 terms)
            acc = acc + dot(dot(s_ref[k], act), w_ref[k])
        return jnp.maximum(acc + b_ref[...], 0.0)

    a2 = conv_by_offsets(a1, s2_ref, w2_ref, b2_ref)            # (OH2*OW2, 64)
    a3 = conv_by_offsets(a2, s3_ref, w3_ref, b3_ref)            # (OH3*OW3, 64)

    # fc + ReLU.  PyTorch's channel-major flatten is folded into per-position
    # weight slices: fc_pre = sum_pos a3[pos, :] @ Wfc[pos]  (HW3 static dots;
    # HW3 == 1 for the test config).
    h = dot(a3[0:1, :], wfc_ref[0])
    for p in range(1, wfc_ref.shape[0]):             # static unroll
        h = h + dot(a3[p:p + 1, :], wfc_ref[p])
    h = jnp.maximum(h + bfc_ref[...], 0.0)                      # (1, 512)

    # last linear + softmax (all in vregs).
    logits = dot(h, wl_ref[...]) + bl_ref[...]                  # (1, n_out)
    m = jnp.max(logits, axis=-1, keepdims=True)
    e = jnp.exp(logits - m)
    o_ref[0] = e / jnp.sum(e, axis=-1, keepdims=True)           # (1, n_out)


# ---------------------------------------------------------------------------
# Trace-time / one-time helpers (layout only, no per-layer HBM round trips).
# ---------------------------------------------------------------------------
def _im2col_rows(x, kh, kw, stride):
    """x: (N, C, H, W) -> (N, OH*OW, C*kh*kw); column order (Cin, kh, kw)
    matches PyTorch's weight.reshape(Cout, Cin*KH*KW)."""
    n, c, h, w = x.shape
    oh = (h - kh) // stride + 1
    ow = (w - kw) // stride + 1
    cols = []
    for i in range(kh):
        for j in range(kw):
            cols.append(x[:, :, i:i + stride * oh:stride, j:j + stride * ow:stride])
    p = jnp.stack(cols, axis=2)                    # (N, C, kh*kw, OH, OW)
    p = p.reshape(n, c * kh * kw, oh * ow)         # row idx = ci*KH*KW + i*KW + j
    return p.transpose(0, 2, 1)                    # (N, OH*OW, C*KH*KW)


def _build_selection(ih, iw, kh, kw, stride):
    """0/1 matrices S[k, out_pos, in_pos] selecting input row (s*oy+i, s*ox+j)
    for kernel offset k = i*kw + j.  Pure numpy -> constant."""
    oh = (ih - kh) // stride + 1
    ow = (iw - kw) // stride + 1
    s = np.zeros((kh * kw, oh * ow, ih * iw), np.float32)
    for i in range(kh):
        for j in range(kw):
            for oy in range(oh):
                for ox in range(ow):
                    s[i * kw + j, oy * ow + ox,
                      (stride * oy + i) * iw + (stride * ox + j)] = 1.0
    return s


def _prep_offset_weight(w):
    """PyTorch OIHW (Cout, Cin, KH, KW) -> (KH*KW, Cin, Cout), k = i*KW + j."""
    cout, cin, kh, kw = w.shape
    return jnp.transpose(w, (2, 3, 1, 0)).reshape(kh * kw, cin, cout)


def prepare_params(params, input_shape):
    """One-time weight/selection layout prep (kept out of the per-call path)."""
    _, h, w = input_shape
    (k1, s1), (k2, s2_), (k3, s3_) = _CONV_CFG
    oh1, ow1 = (h - k1) // s1 + 1, (w - k1) // s1 + 1
    oh2, ow2 = (oh1 - k2) // s2_ + 1, (ow1 - k2) // s2_ + 1
    oh3, ow3 = (oh2 - k3) // s3_ + 1, (ow2 - k3) // s3_ + 1

    cout1 = params["w1"].shape[0]
    c3 = params["w3"].shape[0]
    hw3 = oh3 * ow3
    nfc = params["wfc"].shape[1]

    return {
        "w1": params["w1"].reshape(cout1, -1).T,                  # (Cin*K1*K1, 32)
        "b1": params["b1"].reshape(1, -1),
        "s2": jnp.asarray(_build_selection(oh1, ow1, k2, k2, s2_)),   # (16, OH2*OW2, OH1*OW1)
        "w2": _prep_offset_weight(params["w2"]),                  # (16, 32, 64)
        "b2": params["b2"].reshape(1, -1),
        "s3": jnp.asarray(_build_selection(oh2, ow2, k3, k3, s3_)),   # (9, OH3*OW3, OH2*OW2)
        "w3": _prep_offset_weight(params["w3"]),                  # (9, 64, 64)
        "b3": params["b3"].reshape(1, -1),
        # PyTorch flatten of (N, C, H3, W3) is channel-major: row = c*HW3 + pos.
        "wfc": params["wfc"].reshape(c3, hw3, nfc).transpose(1, 0, 2),  # (HW3, 64, 512)
        "bfc": params["bfc"].reshape(1, -1),
        "wl": params["wlast"],
        "bl": params["blast"].reshape(1, -1),
    }


# ---------------------------------------------------------------------------
# VPG_p forward (fused)
# ---------------------------------------------------------------------------
@jax.jit
def vpg_p_forward(x, prepped):
    n = x.shape[0]
    (k1, s1), _, _ = _CONV_CFG

    # conv1 patches: one-time layout shuffle on the raw input.
    p1 = _im2col_rows(x, k1, k1, s1)                 # (N, OH1*OW1, Cin*K1*K1)
    n_out = prepped["wl"].shape[1]

    def full_spec(a):
        nd = a.ndim
        return pl.BlockSpec(a.shape, lambda i, _nd=nd: (0,) * _nd)

    args = (p1, prepped["w1"], prepped["b1"],
            prepped["s2"], prepped["w2"], prepped["b2"],
            prepped["s3"], prepped["w3"], prepped["b3"],
            prepped["wfc"], prepped["bfc"], prepped["wl"], prepped["bl"])

    in_specs = [pl.BlockSpec((1,) + p1.shape[1:], lambda i: (i, 0, 0))]
    in_specs += [full_spec(a) for a in args[1:]]

    out = pl.pallas_call(
        fused_vpg_kernel,
        out_shape=jax.ShapeDtypeStruct((n, 1, n_out), jnp.float32),
        grid=(n,),
        in_specs=in_specs,
        out_specs=pl.BlockSpec((1, 1, n_out), lambda i: (i, 0, 0)),
        compiler_params=pltpu.CompilerParams(
            dimension_semantics=("parallel",)),
    )(*args)

    return out.reshape(n, n_out)


# ---------------------------------------------------------------------------
# Parameter init (f32, PyTorch OIHW conventions)
# ---------------------------------------------------------------------------
def init_params(key, input_shape=(4, 36, 36), output_shape=2):
    cin, h, w = input_shape
    ks = jax.random.split(key, 10)

    def lin_init(k, shape, fan_in):
        return (jax.random.normal(k, shape, jnp.float32) / jnp.sqrt(fan_in)).astype(jnp.float32)

    params = {
        "w1": lin_init(ks[0], (32, cin, 8, 8), cin * 64),
        "b1": lin_init(ks[1], (32,), cin * 64),
        "w2": lin_init(ks[2], (64, 32, 4, 4), 32 * 16),
        "b2": lin_init(ks[3], (64,), 32 * 16),
        "w3": lin_init(ks[4], (64, 64, 3, 3), 64 * 9),
        "b3": lin_init(ks[5], (64,), 64 * 9),
    }
    oh, ow = h, w
    for kk, ss in _CONV_CFG:
        oh = (oh - kk) // ss + 1
        ow = (ow - kk) // ss + 1
    conv_out = 64 * oh * ow
    params["wfc"] = lin_init(ks[6], (conv_out, 512), conv_out)   # stored as (K, N)
    params["bfc"] = lin_init(ks[7], (1, 512), conv_out)
    params["wlast"] = lin_init(ks[8], (512, output_shape), 512)
    params["blast"] = lin_init(ks[9], (1, output_shape), 512)
    return params


# ---------------------------------------------------------------------------
# Pure-JAX reference (PyTorch semantics) for correctness check
# ---------------------------------------------------------------------------
def reference_forward(x, params):
    dn = ("NCHW", "OIHW", "NCHW")

    def conv(h, w, b, s):
        y = jax.lax.conv_general_dilated(h, w, (s, s), "VALID", dimension_numbers=dn)
        return jax.nn.relu(y + b.reshape(1, -1, 1, 1))

    h = conv(x, params["w1"], params["b1"], 4)
    h = conv(h, params["w2"], params["b2"], 2)
    h = conv(h, params["w3"], params["b3"], 1)
    flat = h.reshape(h.shape[0], -1)
    fc = jax.nn.relu(flat @ params["wfc"] + params["bfc"])
    logits = fc @ params["wlast"] + params["blast"]
    return jax.nn.softmax(logits, axis=-1)


if __name__ == "__main__":
    key = jax.random.PRNGKey(0)
    k_x, k_p = jax.random.split(key)

    # Smallest spatial size the conv stack (8/4, 4/2, 3/1) supports is 36.
    input_shape = (4, 36, 36)
    batch = 2
    x = jax.random.normal(k_x, (batch,) + input_shape, jnp.float32)

    params = init_params(k_p, input_shape=input_shape, output_shape=2)
    prepped = prepare_params(params, input_shape)

    out = vpg_p_forward(x, prepped)
    out = jax.block_until_ready(out)

    ref = jax.block_until_ready(reference_forward(x, params))
    assert out.shape == (batch, 2)
    assert jnp.allclose(jnp.sum(out, axis=-1), 1.0, atol=1e-5)
    assert jnp.allclose(out, ref, atol=1e-4, rtol=1e-4)

    print("KERNEL_OK")
</pallas_src>

<mosaic_0001>
module attributes {stable_mosaic.version = 11 : i64} {
  func.func @fused_vpg_kernel(%arg0: i32, %arg1: memref<1x64x256xf32, #tpu.memory_space<vmem>>, %arg2: memref<256x32xf32, #tpu.memory_space<vmem>>, %arg3: memref<1x32xf32, #tpu.memory_space<vmem>>, %arg4: memref<16x9x64xf32, #tpu.memory_space<vmem>>, %arg5: memref<16x32x64xf32, #tpu.memory_space<vmem>>, %arg6: memref<1x64xf32, #tpu.memory_space<vmem>>, %arg7: memref<9x1x9xf32, #tpu.memory_space<vmem>>, %arg8: memref<9x64x64xf32, #tpu.memory_space<vmem>>, %arg9: memref<1x64xf32, #tpu.memory_space<vmem>>, %arg10: memref<1x64x512xf32, #tpu.memory_space<vmem>>, %arg11: memref<1x512xf32, #tpu.memory_space<vmem>>, %arg12: memref<512x2xf32, #tpu.memory_space<vmem>>, %arg13: memref<1x2xf32, #tpu.memory_space<vmem>>, %arg14: memref<1x1x2xf32, #tpu.memory_space<vmem>>) attributes {dimension_semantics = [#tpu.dimension_semantics<parallel>], iteration_bounds = array<i64: 2>, scalar_prefetch = 0 : i64, scratch_operands = 0 : i64, tpu.core_type = #tpu.core_type<tc>, window_params = [{transform_indices = @transform_0, window_bounds = array<i64: 1, 64, 256>}, {pipeline_mode = #tpu.pipeline_mode<synchronous>, transform_indices = @transform_1, window_bounds = array<i64: 256, 32>}, {pipeline_mode = #tpu.pipeline_mode<synchronous>, transform_indices = @transform_2, window_bounds = array<i64: 1, 32>}, {pipeline_mode = #tpu.pipeline_mode<synchronous>, transform_indices = @transform_3, window_bounds = array<i64: 16, 9, 64>}, {pipeline_mode = #tpu.pipeline_mode<synchronous>, transform_indices = @transform_4, window_bounds = array<i64: 16, 32, 64>}, {pipeline_mode = #tpu.pipeline_mode<synchronous>, transform_indices = @transform_5, window_bounds = array<i64: 1, 64>}, {pipeline_mode = #tpu.pipeline_mode<synchronous>, transform_indices = @transform_6, window_bounds = array<i64: 9, 1, 9>}, {pipeline_mode = #tpu.pipeline_mode<synchronous>, transform_indices = @transform_7, window_bounds = array<i64: 9, 64, 64>}, {pipeline_mode = #tpu.pipeline_mode<synchronous>, transform_indices = @transform_8, window_bounds = array<i64: 1, 64>}, {pipeline_mode = #tpu.pipeline_mode<synchronous>, transform_indices = @transform_9, window_bounds = array<i64: 1, 64, 512>}, {pipeline_mode = #tpu.pipeline_mode<synchronous>, transform_indices = @transform_10, window_bounds = array<i64: 1, 512>}, {pipeline_mode = #tpu.pipeline_mode<synchronous>, transform_indices = @transform_11, window_bounds = array<i64: 512, 2>}, {pipeline_mode = #tpu.pipeline_mode<synchronous>, transform_indices = @transform_12, window_bounds = array<i64: 1, 2>}, {transform_indices = @transform_13, window_bounds = array<i64: 1, 1, 2>}]} {
    %c0 = arith.constant 0 : index
    %c0_0 = arith.constant 0 : index
    %c0_1 = arith.constant 0 : index
    %0 = vector.load %arg1[%c0, %c0_0, %c0_1] : memref<1x64x256xf32, #tpu.memory_space<vmem>>, vector<1x64x256xf32>
    %1 = vector.shape_cast %0 : vector<1x64x256xf32> to vector<64x256xf32>
    %c0_2 = arith.constant 0 : index
    %c0_3 = arith.constant 0 : index
    %2 = vector.load %arg2[%c0_2, %c0_3] : memref<256x32xf32, #tpu.memory_space<vmem>>, vector<256x32xf32>
    %cst = arith.constant dense<0.000000e+00> : vector<64x32xf32>
    %3 = tpu.matmul %1, %2, %cst {dimension_numbers = #tpu.dot_dimension_numbers<[1], [0], [0], [1], [0, 0, 1, 1], [], []>} : vector<64x256xf32>, vector<256x32xf32>, vector<64x32xf32> -> vector<64x32xf32>
    %c0_4 = arith.constant 0 : index
    %c0_5 = arith.constant 0 : index
    %4 = vector.load %arg3[%c0_4, %c0_5] : memref<1x32xf32, #tpu.memory_space<vmem>>, vector<1x32xf32>
    %5 = vector.broadcast %4 : vector<1x32xf32> to vector<64x32xf32>
    %6 = arith.addf %3, %5 : vector<64x32xf32>
    %cst_6 = arith.constant 0.000000e+00 : f32
    %7 = vector.broadcast %cst_6 : f32 to vector<64x32xf32>
    %8 = arith.maximumf %6, %7 : vector<64x32xf32>
    %c0_7 = arith.constant 0 : index
    %c0_8 = arith.constant 0 : index
    %c0_9 = arith.constant 0 : index
    %9 = vector.load %arg4[%c0_7, %c0_8, %c0_9] : memref<16x9x64xf32, #tpu.memory_space<vmem>>, vector<1x9x64xf32>
    %10 = vector.shape_cast %9 : vector<1x9x64xf32> to vector<9x64xf32>
    %cst_10 = arith.constant dense<0.000000e+00> : vector<9x32xf32>
    %11 = tpu.matmul %10, %8, %cst_10 {dimension_numbers = #tpu.dot_dimension_numbers<[1], [0], [0], [1], [0, 0, 1, 1], [], []>} : vector<9x64xf32>, vector<64x32xf32>, vector<9x32xf32> -> vector<9x32xf32>
    %c0_11 = arith.constant 0 : index
    %c0_12 = arith.constant 0 : index
    %c0_13 = arith.constant 0 : index
    %12 = vector.load %arg5[%c0_11, %c0_12, %c0_13] : memref<16x32x64xf32, #tpu.memory_space<vmem>>, vector<1x32x64xf32>
    %13 = vector.shape_cast %12 : vector<1x32x64xf32> to vector<32x64xf32>
    %cst_14 = arith.constant dense<0.000000e+00> : vector<9x64xf32>
    %14 = tpu.matmul %11, %13, %cst_14 {dimension_numbers = #tpu.dot_dimension_numbers<[1], [0], [0], [1], [0, 0, 1, 1], [], []>} : vector<9x32xf32>, vector<32x64xf32>, vector<9x64xf32> -> vector<9x64xf32>
    %c1 = arith.constant 1 : index
    %c0_15 = arith.constant 0 : index
    %c0_16 = arith.constant 0 : index
    %15 = vector.load %arg4[%c1, %c0_15, %c0_16] : memref<16x9x64xf32, #tpu.memory_space<vmem>>, vector<1x9x64xf32>
    %16 = vector.shape_cast %15 : vector<1x9x64xf32> to vector<9x64xf32>
    %cst_17 = arith.constant dense<0.000000e+00> : vector<9x32xf32>
    %17 = tpu.matmul %16, %8, %cst_17 {dimension_numbers = #tpu.dot_dimension_numbers<[1], [0], [0], [1], [0, 0, 1, 1], [], []>} : vector<9x64xf32>, vector<64x32xf32>, vector<9x32xf32> -> vector<9x32xf32>
    %c1_18 = arith.constant 1 : index
    %c0_19 = arith.constant 0 : index
    %c0_20 = arith.constant 0 : index
    %18 = vector.load %arg5[%c1_18, %c0_19, %c0_20] : memref<16x32x64xf32, #tpu.memory_space<vmem>>, vector<1x32x64xf32>
    %19 = vector.shape_cast %18 : vector<1x32x64xf32> to vector<32x64xf32>
    %cst_21 = arith.constant dense<0.000000e+00> : vector<9x64xf32>
    %20 = tpu.matmul %17, %19, %cst_21 {dimension_numbers = #tpu.dot_dimension_numbers<[1], [0], [0], [1], [0, 0, 1, 1], [], []>} : vector<9x32xf32>, vector<32x64xf32>, vector<9x64xf32> -> vector<9x64xf32>
    %21 = arith.addf %14, %20 : vector<9x64xf32>
    %c2 = arith.constant 2 : index
    %c0_22 = arith.constant 0 : index
    %c0_23 = arith.constant 0 : index
    %22 = vector.load %arg4[%c2, %c0_22, %c0_23] : memref<16x9x64xf32, #tpu.memory_space<vmem>>, vector<1x9x64xf32>
    %23 = vector.shape_cast %22 : vector<1x9x64xf32> to vector<9x64xf32>
    %cst_24 = arith.constant dense<0.000000e+00> : vector<9x32xf32>
    %24 = tpu.matmul %23, %8, %cst_24 {dimension_numbers = #tpu.dot_dimension_numbers<[1], [0], [0], [1], [0, 0, 1, 1], [], []>} : vector<9x64xf32>, vector<64x32xf32>, vector<9x32xf32> -> vector<9x32xf32>
    %c2_25 = arith.constant 2 : index
    %c0_26 = arith.constant 0 : index
    %c0_27 = arith.constant 0 : index
    %25 = vector.load %arg5[%c2_25, %c0_26, %c0_27] : memref<16x32x64xf32, #tpu.memory_space<vmem>>, vector<1x32x64xf32>
    %26 = vector.shape_cast %25 : vector<1x32x64xf32> to vector<32x64xf32>
    %cst_28 = arith.constant dense<0.000000e+00> : vector<9x64xf32>
    %27 = tpu.matmul %24, %26, %cst_28 {dimension_numbers = #tpu.dot_dimension_numbers<[1], [0], [0], [1], [0, 0, 1, 1], [], []>} : vector<9x32xf32>, vector<32x64xf32>, vector<9x64xf32> -> vector<9x64xf32>
    %28 = arith.addf %21, %27 : vector<9x64xf32>
    %c3 = arith.constant 3 : index
    %c0_29 = arith.constant 0 : index
    %c0_30 = arith.constant 0 : index
    %29 = vector.load %arg4[%c3, %c0_29, %c0_30] : memref<16x9x64xf32, #tpu.memory_space<vmem>>, vector<1x9x64xf32>
    %30 = vector.shape_cast %29 : vector<1x9x64xf32> to vector<9x64xf32>
    %cst_31 = arith.constant dense<0.000000e+00> : vector<9x32xf32>
    %31 = tpu.matmul %30, %8, %cst_31 {dimension_numbers = #tpu.dot_dimension_numbers<[1], [0], [0], [1], [0, 0, 1, 1], [], []>} : vector<9x64xf32>, vector<64x32xf32>, vector<9x32xf32> -> vector<9x32xf32>
    %c3_32 = arith.constant 3 : index
    %c0_33 = arith.constant 0 : index
    %c0_34 = arith.constant 0 : index
    %32 = vector.load %arg5[%c3_32, %c0_33, %c0_34] : memref<16x32x64xf32, #tpu.memory_space<vmem>>, vector<1x32x64xf32>
    %33 = vector.shape_cast %32 : vector<1x32x64xf32> to vector<32x64xf32>
    %cst_35 = arith.constant dense<0.000000e+00> : vector<9x64xf32>
    %34 = tpu.matmul %31, %33, %cst_35 {dimension_numbers = #tpu.dot_dimension_numbers<[1], [0], [0], [1], [0, 0, 1, 1], [], []>} : vector<9x32xf32>, vector<32x64xf32>, vector<9x64xf32> -> vector<9x64xf32>
    %35 = arith.addf %28, %34 : vector<9x64xf32>
    %c4 = arith.constant 4 : index
    %c0_36 = arith.constant 0 : index
    %c0_37 = arith.constant 0 : index
    %36 = vector.load %arg4[%c4, %c0_36, %c0_37] : memref<16x9x64xf32, #tpu.memory_space<vmem>>, vector<1x9x64xf32>
    %37 = vector.shape_cast %36 : vector<1x9x64xf32> to vector<9x64xf32>
    %cst_38 = arith.constant dense<0.000000e+00> : vector<9x32xf32>
    %38 = tpu.matmul %37, %8, %cst_38 {dimension_numbers = #tpu.dot_dimension_numbers<[1], [0], [0], [1], [0, 0, 1, 1], [], []>} : vector<9x64xf32>, vector<64x32xf32>, vector<9x32xf32> -> vector<9x32xf32>
    %c4_39 = arith.constant 4 : index
    %c0_40 = arith.constant 0 : index
    %c0_41 = arith.constant 0 : index
    %39 = vector.load %arg5[%c4_39, %c0_40, %c0_41] : memref<16x32x64xf32, #tpu.memory_space<vmem>>, vector<1x32x64xf32>
    %40 = vector.shape_cast %39 : vector<1x32x64xf32> to vector<32x64xf32>
    %cst_42 = arith.constant dense<0.000000e+00> : vector<9x64xf32>
    %41 = tpu.matmul %38, %40, %cst_42 {dimension_numbers = #tpu.dot_dimension_numbers<[1], [0], [0], [1], [0, 0, 1, 1], [], []>} : vector<9x32xf32>, vector<32x64xf32>, vector<9x64xf32> -> vector<9x64xf32>
    %42 = arith.addf %35, %41 : vector<9x64xf32>
    %c5 = arith.constant 5 : index
    %c0_43 = arith.constant 0 : index
    %c0_44 = arith.constant 0 : index
    %43 = vector.load %arg4[%c5, %c0_43, %c0_44] : memref<16x9x64xf32, #tpu.memory_space<vmem>>, vector<1x9x64xf32>
    %44 = vector.shape_cast %43 : vector<1x9x64xf32> to vector<9x64xf32>
    %cst_45 = arith.constant dense<0.000000e+00> : vector<9x32xf32>
    %45 = tpu.matmul %44, %8, %cst_45 {dimension_numbers = #tpu.dot_dimension_numbers<[1], [0], [0], [1], [0, 0, 1, 1], [], []>} : vector<9x64xf32>, vector<64x32xf32>, vector<9x32xf32> -> vector<9x32xf32>
    %c5_46 = arith.constant 5 : index
    %c0_47 = arith.constant 0 : index
    %c0_48 = arith.constant 0 : index
    %46 = vector.load %arg5[%c5_46, %c0_47, %c0_48] : memref<16x32x64xf32, #tpu.memory_space<vmem>>, vector<1x32x64xf32>
    %47 = vector.shape_cast %46 : vector<1x32x64xf32> to vector<32x64xf32>
    %cst_49 = arith.constant dense<0.000000e+00> : vector<9x64xf32>
    %48 = tpu.matmul %45, %47, %cst_49 {dimension_numbers = #tpu.dot_dimension_numbers<[1], [0], [0], [1], [0, 0, 1, 1], [], []>} : vector<9x32xf32>, vector<32x64xf32>, vector<9x64xf32> -> vector<9x64xf32>
    %49 = arith.addf %42, %48 : vector<9x64xf32>
    %c6 = arith.constant 6 : index
    %c0_50 = arith.constant 0 : index
    %c0_51 = arith.constant 0 : index
    %50 = vector.load %arg4[%c6, %c0_50, %c0_51] : memref<16x9x64xf32, #tpu.memory_space<vmem>>, vector<1x9x64xf32>
    %51 = vector.shape_cast %50 : vector<1x9x64xf32> to vector<9x64xf32>
    %cst_52 = arith.constant dense<0.000000e+00> : vector<9x32xf32>
    %52 = tpu.matmul %51, %8, %cst_52 {dimension_numbers = #tpu.dot_dimension_numbers<[1], [0], [0], [1], [0, 0, 1, 1], [], []>} : vector<9x64xf32>, vector<64x32xf32>, vector<9x32xf32> -> vector<9x32xf32>
    %c6_53 = arith.constant 6 : index
    %c0_54 = arith.constant 0 : index
    %c0_55 = arith.constant 0 : index
    %53 = vector.load %arg5[%c6_53, %c0_54, %c0_55] : memref<16x32x64xf32, #tpu.memory_space<vmem>>, vector<1x32x64xf32>
    %54 = vector.shape_cast %53 : vector<1x32x64xf32> to vector<32x64xf32>
    %cst_56 = arith.constant dense<0.000000e+00> : vector<9x64xf32>
    %55 = tpu.matmul %52, %54, %cst_56 {dimension_numbers = #tpu.dot_dimension_numbers<[1], [0], [0], [1], [0, 0, 1, 1], [], []>} : vector<9x32xf32>, vector<32x64xf32>, vector<9x64xf32> -> vector<9x64xf32>
    %56 = arith.addf %49, %55 : vector<9x64xf32>
    %c7 = arith.constant 7 : index
    %c0_57 = arith.constant 0 : index
    %c0_58 = arith.constant 0 : index
    %57 = vector.load %arg4[%c7, %c0_57, %c0_58] : memref<16x9x64xf32, #tpu.memory_space<vmem>>, vector<1x9x64xf32>
    %58 = vector.shape_cast %57 : vector<1x9x64xf32> to vector<9x64xf32>
    %cst_59 = arith.constant dense<0.000000e+00> : vector<9x32xf32>
    %59 = tpu.matmul %58, %8, %cst_59 {dimension_numbers = #tpu.dot_dimension_numbers<[1], [0], [0], [1], [0, 0, 1, 1], [], []>} : vector<9x64xf32>, vector<64x32xf32>, vector<9x32xf32> -> vector<9x32xf32>
    %c7_60 = arith.constant 7 : index
    %c0_61 = arith.constant 0 : index
    %c0_62 = arith.constant 0 : index
    %60 = vector.load %arg5[%c7_60, %c0_61, %c0_62] : memref<16x32x64xf32, #tpu.memory_space<vmem>>, vector<1x32x64xf32>
    %61 = vector.shape_cast %60 : vector<1x32x64xf32> to vector<32x64xf32>
    %cst_63 = arith.constant dense<0.000000e+00> : vector<9x64xf32>
    %62 = tpu.matmul %59, %61, %cst_63 {dimension_numbers = #tpu.dot_dimension_numbers<[1], [0], [0], [1], [0, 0, 1, 1], [], []>} : vector<9x32xf32>, vector<32x64xf32>, vector<9x64xf32> -> vector<9x64xf32>
    %63 = arith.addf %56, %62 : vector<9x64xf32>
    %c8 = arith.constant 8 : index
    %c0_64 = arith.constant 0 : index
    %c0_65 = arith.constant 0 : index
    %64 = vector.load %arg4[%c8, %c0_64, %c0_65] : memref<16x9x64xf32, #tpu.memory_space<vmem>>, vector<1x9x64xf32>
    %65 = vector.shape_cast %64 : vector<1x9x64xf32> to vector<9x64xf32>
    %cst_66 = arith.constant dense<0.000000e+00> : vector<9x32xf32>
    %66 = tpu.matmul %65, %8, %cst_66 {dimension_numbers = #tpu.dot_dimension_numbers<[1], [0], [0], [1], [0, 0, 1, 1], [], []>} : vector<9x64xf32>, vector<64x32xf32>, vector<9x32xf32> -> vector<9x32xf32>
    %c8_67 = arith.constant 8 : index
    %c0_68 = arith.constant 0 : index
    %c0_69 = arith.constant 0 : index
    %67 = vector.load %arg5[%c8_67, %c0_68, %c0_69] : memref<16x32x64xf32, #tpu.memory_space<vmem>>, vector<1x32x64xf32>
    %68 = vector.shape_cast %67 : vector<1x32x64xf32> to vector<32x64xf32>
    %cst_70 = arith.constant dense<0.000000e+00> : vector<9x64xf32>
    %69 = tpu.matmul %66, %68, %cst_70 {dimension_numbers = #tpu.dot_dimension_numbers<[1], [0], [0], [1], [0, 0, 1, 1], [], []>} : vector<9x32xf32>, vector<32x64xf32>, vector<9x64xf32> -> vector<9x64xf32>
    %70 = arith.addf %63, %69 : vector<9x64xf32>
    %c9 = arith.constant 9 : index
    %c0_71 = arith.constant 0 : index
    %c0_72 = arith.constant 0 : index
    %71 = vector.load %arg4[%c9, %c0_71, %c0_72] : memref<16x9x64xf32, #tpu.memory_space<vmem>>, vector<1x9x64xf32>
    %72 = vector.shape_cast %71 : vector<1x9x64xf32> to vector<9x64xf32>
    %cst_73 = arith.constant dense<0.000000e+00> : vector<9x32xf32>
    %73 = tpu.matmul %72, %8, %cst_73 {dimension_numbers = #tpu.dot_dimension_numbers<[1], [0], [0], [1], [0, 0, 1, 1], [], []>} : vector<9x64xf32>, vector<64x32xf32>, vector<9x32xf32> -> vector<9x32xf32>
    %c9_74 = arith.constant 9 : index
    %c0_75 = arith.constant 0 : index
    %c0_76 = arith.constant 0 : index
    %74 = vector.load %arg5[%c9_74, %c0_75, %c0_76] : memref<16x32x64xf32, #tpu.memory_space<vmem>>, vector<1x32x64xf32>
    %75 = vector.shape_cast %74 : vector<1x32x64xf32> to vector<32x64xf32>
    %cst_77 = arith.constant dense<0.000000e+00> : vector<9x64xf32>
    %76 = tpu.matmul %73, %75, %cst_77 {dimension_numbers = #tpu.dot_dimension_numbers<[1], [0], [0], [1], [0, 0, 1, 1], [], []>} : vector<9x32xf32>, vector<32x64xf32>, vector<9x64xf32> -> vector<9x64xf32>
    %77 = arith.addf %70, %76 : vector<9x64xf32>
    %c10 = arith.constant 10 : index
    %c0_78 = arith.constant 0 : index
    %c0_79 = arith.constant 0 : index
    %78 = vector.load %arg4[%c10, %c0_78, %c0_79] : memref<16x9x64xf32, #tpu.memory_space<vmem>>, vector<1x9x64xf32>
    %79 = vector.shape_cast %78 : vector<1x9x64xf32> to vector<9x64xf32>
    %cst_80 = arith.constant dense<0.000000e+00> : vector<9x32xf32>
    %80 = tpu.matmul %79, %8, %cst_80 {dimension_numbers = #tpu.dot_dimension_numbers<[1], [0], [0], [1], [0, 0, 1, 1], [], []>} : vector<9x64xf32>, vector<64x32xf32>, vector<9x32xf32> -> vector<9x32xf32>
    %c10_81 = arith.constant 10 : index
    %c0_82 = arith.constant 0 : index
    %c0_83 = arith.constant 0 : index
    %81 = vector.load %arg5[%c10_81, %c0_82, %c0_83] : memref<16x32x64xf32, #tpu.memory_space<vmem>>, vector<1x32x64xf32>
    %82 = vector.shape_cast %81 : vector<1x32x64xf32> to vector<32x64xf32>
    %cst_84 = arith.constant dense<0.000000e+00> : vector<9x64xf32>
    %83 = tpu.matmul %80, %82, %cst_84 {dimension_numbers = #tpu.dot_dimension_numbers<[1], [0], [0], [1], [0, 0, 1, 1], [], []>} : vector<9x32xf32>, vector<32x64xf32>, vector<9x64xf32> -> vector<9x64xf32>
    %84 = arith.addf %77, %83 : vector<9x64xf32>
    %c11 = arith.constant 11 : index
    %c0_85 = arith.constant 0 : index
    %c0_86 = arith.constant 0 : index
    %85 = vector.load %arg4[%c11, %c0_85, %c0_86] : memref<16x9x64xf32, #tpu.memory_space<vmem>>, vector<1x9x64xf32>
    %86 = vector.shape_cast %85 : vector<1x9x64xf32> to vector<9x64xf32>
    %cst_87 = arith.constant dense<0.000000e+00> : vector<9x32xf32>
    %87 = tpu.matmul %86, %8, %cst_87 {dimension_numbers = #tpu.dot_dimension_numbers<[1], [0], [0], [1], [0, 0, 1, 1], [], []>} : vector<9x64xf32>, vector<64x32xf32>, vector<9x32xf32> -> vector<9x32xf32>
    %c11_88 = arith.constant 11 : index
    %c0_89 = arith.constant 0 : index
    %c0_90 = arith.constant 0 : index
    %88 = vector.load %arg5[%c11_88, %c0_89, %c0_90] : memref<16x32x64xf32, #tpu.memory_space<vmem>>, vector<1x32x64xf32>
    %89 = vector.shape_cast %88 : vector<1x32x64xf32> to vector<32x64xf32>
    %cst_91 = arith.constant dense<0.000000e+00> : vector<9x64xf32>
    %90 = tpu.matmul %87, %89, %cst_91 {dimension_numbers = #tpu.dot_dimension_numbers<[1], [0], [0], [1], [0, 0, 1, 1], [], []>} : vector<9x32xf32>, vector<32x64xf32>, vector<9x64xf32> -> vector<9x64xf32>
    %91 = arith.addf %84, %90 : vector<9x64xf32>
    %c12 = arith.constant 12 : index
    %c0_92 = arith.constant 0 : index
    %c0_93 = arith.constant 0 : index
    %92 = vector.load %arg4[%c12, %c0_92, %c0_93] : memref<16x9x64xf32, #tpu.memory_space<vmem>>, vector<1x9x64xf32>
    %93 = vector.shape_cast %92 : vector<1x9x64xf32> to vector<9x64xf32>
    %cst_94 = arith.constant dense<0.000000e+00> : vector<9x32xf32>
    %94 = tpu.matmul %93, %8, %cst_94 {dimension_numbers = #tpu.dot_dimension_numbers<[1], [0], [0], [1], [0, 0, 1, 1], [], []>} : vector<9x64xf32>, vector<64x32xf32>, vector<9x32xf32> -> vector<9x32xf32>
    %c12_95 = arith.constant 12 : index
    %c0_96 = arith.constant 0 : index
    %c0_97 = arith.constant 0 : index
    %95 = vector.load %arg5[%c12_95, %c0_96, %c0_97] : memref<16x32x64xf32, #tpu.memory_space<vmem>>, vector<1x32x64xf32>
    %96 = vector.shape_cast %95 : vector<1x32x64xf32> to vector<32x64xf32>
    %cst_98 = arith.constant dense<0.000000e+00> : vector<9x64xf32>
    %97 = tpu.matmul %94, %96, %cst_98 {dimension_numbers = #tpu.dot_dimension_numbers<[1], [0], [0], [1], [0, 0, 1, 1], [], []>} : vector<9x32xf32>, vector<32x64xf32>, vector<9x64xf32> -> vector<9x64xf32>
    %98 = arith.addf %91, %97 : vector<9x64xf32>
    %c13 = arith.constant 13 : index
    %c0_99 = arith.constant 0 : index
    %c0_100 = arith.constant 0 : index
    %99 = vector.load %arg4[%c13, %c0_99, %c0_100] : memref<16x9x64xf32, #tpu.memory_space<vmem>>, vector<1x9x64xf32>
    %100 = vector.shape_cast %99 : vector<1x9x64xf32> to vector<9x64xf32>
    %cst_101 = arith.constant dense<0.000000e+00> : vector<9x32xf32>
    %101 = tpu.matmul %100, %8, %cst_101 {dimension_numbers = #tpu.dot_dimension_numbers<[1], [0], [0], [1], [0, 0, 1, 1], [], []>} : vector<9x64xf32>, vector<64x32xf32>, vector<9x32xf32> -> vector<9x32xf32>
    %c13_102 = arith.constant 13 : index
    %c0_103 = arith.constant 0 : index
    %c0_104 = arith.constant 0 : index
    %102 = vector.load %arg5[%c13_102, %c0_103, %c0_104] : memref<16x32x64xf32, #tpu.memory_space<vmem>>, vector<1x32x64xf32>
    %103 = vector.shape_cast %102 : vector<1x32x64xf32> to vector<32x64xf32>
    %cst_105 = arith.constant dense<0.000000e+00> : vector<9x64xf32>
    %104 = tpu.matmul %101, %103, %cst_105 {dimension_numbers = #tpu.dot_dimension_numbers<[1], [0], [0], [1], [0, 0, 1, 1], [], []>} : vector<9x32xf32>, vector<32x64xf32>, vector<9x64xf32> -> vector<9x64xf32>
    %105 = arith.addf %98, %104 : vector<9x64xf32>
    %c14 = arith.constant 14 : index
    %c0_106 = arith.constant 0 : index
    %c0_107 = arith.constant 0 : index
    %106 = vector.load %arg4[%c14, %c0_106, %c0_107] : memref<16x9x64xf32, #tpu.memory_space<vmem>>, vector<1x9x64xf32>
    %107 = vector.shape_cast %106 : vector<1x9x64xf32> to vector<9x64xf32>
    %cst_108 = arith.constant dense<0.000000e+00> : vector<9x32xf32>
    %108 = tpu.matmul %107, %8, %cst_108 {dimension_numbers = #tpu.dot_dimension_numbers<[1], [0], [0], [1], [0, 0, 1, 1], [], []>} : vector<9x64xf32>, vector<64x32xf32>, vector<9x32xf32> -> vector<9x32xf32>
    %c14_109 = arith.constant 14 : index
    %c0_110 = arith.constant 0 : index
    %c0_111 = arith.constant 0 : index
    %109 = vector.load %arg5[%c14_109, %c0_110, %c0_111] : memref<16x32x64xf32, #tpu.memory_space<vmem>>, vector<1x32x64xf32>
    %110 = vector.shape_cast %109 : vector<1x32x64xf32> to vector<32x64xf32>
    %cst_112 = arith.constant dense<0.000000e+00> : vector<9x64xf32>
    %111 = tpu.matmul %108, %110, %cst_112 {dimension_numbers = #tpu.dot_dimension_numbers<[1], [0], [0], [1], [0, 0, 1, 1], [], []>} : vector<9x32xf32>, vector<32x64xf32>, vector<9x64xf32> -> vector<9x64xf32>
    %112 = arith.addf %105, %111 : vector<9x64xf32>
    %c15 = arith.constant 15 : index
    %c0_113 = arith.constant 0 : index
    %c0_114 = arith.constant 0 : index
    %113 = vector.load %arg4[%c15, %c0_113, %c0_114] : memref<16x9x64xf32, #tpu.memory_space<vmem>>, vector<1x9x64xf32>
    %114 = vector.shape_cast %113 : vector<1x9x64xf32> to vector<9x64xf32>
    %cst_115 = arith.constant dense<0.000000e+00> : vector<9x32xf32>
    %115 = tpu.matmul %114, %8, %cst_115 {dimension_numbers = #tpu.dot_dimension_numbers<[1], [0], [0], [1], [0, 0, 1, 1], [], []>} : vector<9x64xf32>, vector<64x32xf32>, vector<9x32xf32> -> vector<9x32xf32>
    %c15_116 = arith.constant 15 : index
    %c0_117 = arith.constant 0 : index
    %c0_118 = arith.constant 0 : index
    %116 = vector.load %arg5[%c15_116, %c0_117, %c0_118] : memref<16x32x64xf32, #tpu.memory_space<vmem>>, vector<1x32x64xf32>
    %117 = vector.shape_cast %116 : vector<1x32x64xf32> to vector<32x64xf32>
    %cst_119 = arith.constant dense<0.000000e+00> : vector<9x64xf32>
    %118 = tpu.matmul %115, %117, %cst_119 {dimension_numbers = #tpu.dot_dimension_numbers<[1], [0], [0], [1], [0, 0, 1, 1], [], []>} : vector<9x32xf32>, vector<32x64xf32>, vector<9x64xf32> -> vector<9x64xf32>
    %119 = arith.addf %112, %118 : vector<9x64xf32>
    %c0_120 = arith.constant 0 : index
    %c0_121 = arith.constant 0 : index
    %120 = vector.load %arg6[%c0_120, %c0_121] : memref<1x64xf32, #tpu.memory_space<vmem>>, vector<1x64xf32>
    %121 = vector.broadcast %120 : vector<1x64xf32> to vector<9x64xf32>
    %122 = arith.addf %119, %121 : vector<9x64xf32>
    %cst_122 = arith.constant 0.000000e+00 : f32
    %123 = vector.broadcast %cst_122 : f32 to vector<9x64xf32>
    %124 = arith.maximumf %122, %123 : vector<9x64xf32>
    %c0_123 = arith.constant 0 : index
    %c0_124 = arith.constant 0 : index
    %c0_125 = arith.constant 0 : index
    %125 = vector.load %arg7[%c0_123, %c0_124, %c0_125] : memref<9x1x9xf32, #tpu.memory_space<vmem>>, vector<1x1x9xf32>
    %126 = vector.shape_cast %125 : vector<1x1x9xf32> to vector<1x9xf32>
    %cst_126 = arith.constant dense<0.000000e+00> : vector<1x64xf32>
    %127 = tpu.matmul %126, %124, %cst_126 {dimension_numbers = #tpu.dot_dimension_numbers<[1], [0], [0], [1], [0, 0, 1, 1], [], []>} : vector<1x9xf32>, vector<9x64xf32>, vector<1x64xf32> -> vector<1x64xf32>
    %c0_127 = arith.constant 0 : index
    %c0_128 = arith.constant 0 : index
    %c0_129 = arith.constant 0 : index
    %128 = vector.load %arg8[%c0_127, %c0_128, %c0_129] : memref<9x64x64xf32, #tpu.memory_space<vmem>>, vector<1x64x64xf32>
    %129 = vector.shape_cast %128 : vector<1x64x64xf32> to vector<64x64xf32>
    %cst_130 = arith.constant dense<0.000000e+00> : vector<1x64xf32>
    %130 = tpu.matmul %127, %129, %cst_130 {dimension_numbers = #tpu.dot_dimension_numbers<[1], [0], [0], [1], [0, 0, 1, 1], [], []>} : vector<1x64xf32>, vector<64x64xf32>, vector<1x64xf32> -> vector<1x64xf32>
    %c1_131 = arith.constant 1 : index
    %c0_132 = arith.constant 0 : index
    %c0_133 = arith.constant 0 : index
    %131 = vector.load %arg7[%c1_131, %c0_132, %c0_133] : memref<9x1x9xf32, #tpu.memory_space<vmem>>, vector<1x1x9xf32>
    %132 = vector.shape_cast %131 : vector<1x1x9xf32> to vector<1x9xf32>
    %cst_134 = arith.constant dense<0.000000e+00> : vector<1x64xf32>
    %133 = tpu.matmul %132, %124, %cst_134 {dimension_numbers = #tpu.dot_dimension_numbers<[1], [0], [0], [1], [0, 0, 1, 1], [], []>} : vector<1x9xf32>, vector<9x64xf32>, vector<1x64xf32> -> vector<1x64xf32>
    %c1_135 = arith.constant 1 : index
    %c0_136 = arith.constant 0 : index
    %c0_137 = arith.constant 0 : index
    %134 = vector.load %arg8[%c1_135, %c0_136, %c0_137] : memref<9x64x64xf32, #tpu.memory_space<vmem>>, vector<1x64x64xf32>
    %135 = vector.shape_cast %134 : vector<1x64x64xf32> to vector<64x64xf32>
    %cst_138 = arith.constant dense<0.000000e+00> : vector<1x64xf32>
    %136 = tpu.matmul %133, %135, %cst_138 {dimension_numbers = #tpu.dot_dimension_numbers<[1], [0], [0], [1], [0, 0, 1, 1], [], []>} : vector<1x64xf32>, vector<64x64xf32>, vector<1x64xf32> -> vector<1x64xf32>
    %137 = arith.addf %130, %136 : vector<1x64xf32>
    %c2_139 = arith.constant 2 : index
    %c0_140 = arith.constant 0 : index
    %c0_141 = arith.constant 0 : index
    %138 = vector.load %arg7[%c2_139, %c0_140, %c0_141] : memref<9x1x9xf32, #tpu.memory_space<vmem>>, vector<1x1x9xf32>
    %139 = vector.shape_cast %138 : vector<1x1x9xf32> to vector<1x9xf32>
    %cst_142 = arith.constant dense<0.000000e+00> : vector<1x64xf32>
    %140 = tpu.matmul %139, %124, %cst_142 {dimension_numbers = #tpu.dot_dimension_numbers<[1], [0], [0], [1], [0, 0, 1, 1], [], []>} : vector<1x9xf32>, vector<9x64xf32>, vector<1x64xf32> -> vector<1x64xf32>
    %c2_143 = arith.constant 2 : index
    %c0_144 = arith.constant 0 : index
    %c0_145 = arith.constant 0 : index
    %141 = vector.load %arg8[%c2_143, %c0_144, %c0_145] : memref<9x64x64xf32, #tpu.memory_space<vmem>>, vector<1x64x64xf32>
    %142 = vector.shape_cast %141 : vector<1x64x64xf32> to vector<64x64xf32>
    %cst_146 = arith.constant dense<0.000000e+00> : vector<1x64xf32>
    %143 = tpu.matmul %140, %142, %cst_146 {dimension_numbers = #tpu.dot_dimension_numbers<[1], [0], [0], [1], [0, 0, 1, 1], [], []>} : vector<1x64xf32>, vector<64x64xf32>, vector<1x64xf32> -> vector<1x64xf32>
    %144 = arith.addf %137, %143 : vector<1x64xf32>
    %c3_147 = arith.constant 3 : index
    %c0_148 = arith.constant 0 : index
    %c0_149 = arith.constant 0 : index
    %145 = vector.load %arg7[%c3_147, %c0_148, %c0_149] : memref<9x1x9xf32, #tpu.memory_space<vmem>>, vector<1x1x9xf32>
    %146 = vector.shape_cast %145 : vector<1x1x9xf32> to vector<1x9xf32>
    %cst_150 = arith.constant dense<0.000000e+00> : vector<1x64xf32>
    %147 = tpu.matmul %146, %124, %cst_150 {dimension_numbers = #tpu.dot_dimension_numbers<[1], [0], [0], [1], [0, 0, 1, 1], [], []>} : vector<1x9xf32>, vector<9x64xf32>, vector<1x64xf32> -> vector<1x64xf32>
    %c3_151 = arith.constant 3 : index
    %c0_152 = arith.constant 0 : index
    %c0_153 = arith.constant 0 : index
    %148 = vector.load %arg8[%c3_151, %c0_152, %c0_153] : memref<9x64x64xf32, #tpu.memory_space<vmem>>, vector<1x64x64xf32>
    %149 = vector.shape_cast %148 : vector<1x64x64xf32> to vector<64x64xf32>
    %cst_154 = arith.constant dense<0.000000e+00> : vector<1x64xf32>
    %150 = tpu.matmul %147, %149, %cst_154 {dimension_numbers = #tpu.dot_dimension_numbers<[1], [0], [0], [1], [0, 0, 1, 1], [], []>} : vector<1x64xf32>, vector<64x64xf32>, vector<1x64xf32> -> vector<1x64xf32>
    %151 = arith.addf %144, %150 : vector<1x64xf32>
    %c4_155 = arith.constant 4 : index
    %c0_156 = arith.constant 0 : index
    %c0_157 = arith.constant 0 : index
    %152 = vector.load %arg7[%c4_155, %c0_156, %c0_157] : memref<9x1x9xf32, #tpu.memory_space<vmem>>, vector<1x1x9xf32>
    %153 = vector.shape_cast %152 : vector<1x1x9xf32> to vector<1x9xf32>
    %cst_158 = arith.constant dense<0.000000e+00> : vector<1x64xf32>
    %154 = tpu.matmul %153, %124, %cst_158 {dimension_numbers = #tpu.dot_dimension_numbers<[1], [0], [0], [1], [0, 0, 1, 1], [], []>} : vector<1x9xf32>, vector<9x64xf32>, vector<1x64xf32> -> vector<1x64xf32>
    %c4_159 = arith.constant 4 : index
    %c0_160 = arith.constant 0 : index
    %c0_161 = arith.constant 0 : index
    %155 = vector.load %arg8[%c4_159, %c0_160, %c0_161] : memref<9x64x64xf32, #tpu.memory_space<vmem>>, vector<1x64x64xf32>
    %156 = vector.shape_cast %155 : vector<1x64x64xf32> to vector<64x64xf32>
    %cst_162 = arith.constant dense<0.000000e+00> : vector<1x64xf32>
    %157 = tpu.matmul %154, %156, %cst_162 {dimension_numbers = #tpu.dot_dimension_numbers<[1], [0], [0], [1], [0, 0, 1, 1], [], []>} : vector<1x64xf32>, vector<64x64xf32>, vector<1x64xf32> -> vector<1x64xf32>
    %158 = arith.addf %151, %157 : vector<1x64xf32>
    %c5_163 = arith.constant 5 : index
    %c0_164 = arith.constant 0 : index
    %c0_165 = arith.constant 0 : index
    %159 = vector.load %arg7[%c5_163, %c0_164, %c0_165] : memref<9x1x9xf32, #tpu.memory_space<vmem>>, vector<1x1x9xf32>
    %160 = vector.shape_cast %159 : vector<1x1x9xf32> to vector<1x9xf32>
    %cst_166 = arith.constant dense<0.000000e+00> : vector<1x64xf32>
    %161 = tpu.matmul %160, %124, %cst_166 {dimension_numbers = #tpu.dot_dimension_numbers<[1], [0], [0], [1], [0, 0, 1, 1], [], []>} : vector<1x9xf32>, vector<9x64xf32>, vector<1x64xf32> -> vector<1x64xf32>
    %c5_167 = arith.constant 5 : index
    %c0_168 = arith.constant 0 : index
    %c0_169 = arith.constant 0 : index
    %162 = vector.load %arg8[%c5_167, %c0_168, %c0_169] : memref<9x64x64xf32, #tpu.memory_space<vmem>>, vector<1x64x64xf32>
    %163 = vector.shape_cast %162 : vector<1x64x64xf32> to vector<64x64xf32>
    %cst_170 = arith.constant dense<0.000000e+00> : vector<1x64xf32>
    %164 = tpu.matmul %161, %163, %cst_170 {dimension_numbers = #tpu.dot_dimension_numbers<[1], [0], [0], [1], [0, 0, 1, 1], [], []>} : vector<1x64xf32>, vector<64x64xf32>, vector<1x64xf32> -> vector<1x64xf32>
    %165 = arith.addf %158, %164 : vector<1x64xf32>
    %c6_171 = arith.constant 6 : index
    %c0_172 = arith.constant 0 : index
    %c0_173 = arith.constant 0 : index
    %166 = vector.load %arg7[%c6_171, %c0_172, %c0_173] : memref<9x1x9xf32, #tpu.memory_space<vmem>>, vector<1x1x9xf32>
    %167 = vector.shape_cast %166 : vector<1x1x9xf32> to vector<1x9xf32>
    %cst_174 = arith.constant dense<0.000000e+00> : vector<1x64xf32>
    %168 = tpu.matmul %167, %124, %cst_174 {dimension_numbers = #tpu.dot_dimension_numbers<[1], [0], [0], [1], [0, 0, 1, 1], [], []>} : vector<1x9xf32>, vector<9x64xf32>, vector<1x64xf32> -> vector<1x64xf32>
    %c6_175 = arith.constant 6 : index
    %c0_176 = arith.constant 0 : index
    %c0_177 = arith.constant 0 : index
    %169 = vector.load %arg8[%c6_175, %c0_176, %c0_177] : memref<9x64x64xf32, #tpu.memory_space<vmem>>, vector<1x64x64xf32>
    %170 = vector.shape_cast %169 : vector<1x64x64xf32> to vector<64x64xf32>
    %cst_178 = arith.constant dense<0.000000e+00> : vector<1x64xf32>
    %171 = tpu.matmul %168, %170, %cst_178 {dimension_numbers = #tpu.dot_dimension_numbers<[1], [0], [0], [1], [0, 0, 1, 1], [], []>} : vector<1x64xf32>, vector<64x64xf32>, vector<1x64xf32> -> vector<1x64xf32>
    %172 = arith.addf %165, %171 : vector<1x64xf32>
    %c7_179 = arith.constant 7 : index
    %c0_180 = arith.constant 0 : index
    %c0_181 = arith.constant 0 : index
    %173 = vector.load %arg7[%c7_179, %c0_180, %c0_181] : memref<9x1x9xf32, #tpu.memory_space<vmem>>, vector<1x1x9xf32>
    %174 = vector.shape_cast %173 : vector<1x1x9xf32> to vector<1x9xf32>
    %cst_182 = arith.constant dense<0.000000e+00> : vector<1x64xf32>
    %175 = tpu.matmul %174, %124, %cst_182 {dimension_numbers = #tpu.dot_dimension_numbers<[1], [0], [0], [1], [0, 0, 1, 1], [], []>} : vector<1x9xf32>, vector<9x64xf32>, vector<1x64xf32> -> vector<1x64xf32>
    %c7_183 = arith.constant 7 : index
    %c0_184 = arith.constant 0 : index
    %c0_185 = arith.constant 0 : index
    %176 = vector.load %arg8[%c7_183, %c0_184, %c0_185] : memref<9x64x64xf32, #tpu.memory_space<vmem>>, vector<1x64x64xf32>
    %177 = vector.shape_cast %176 : vector<1x64x64xf32> to vector<64x64xf32>
    %cst_186 = arith.constant dense<0.000000e+00> : vector<1x64xf32>
    %178 = tpu.matmul %175, %177, %cst_186 {dimension_numbers = #tpu.dot_dimension_numbers<[1], [0], [0], [1], [0, 0, 1, 1], [], []>} : vector<1x64xf32>, vector<64x64xf32>, vector<1x64xf32> -> vector<1x64xf32>
    %179 = arith.addf %172, %178 : vector<1x64xf32>
    %c8_187 = arith.constant 8 : index
    %c0_188 = arith.constant 0 : index
    %c0_189 = arith.constant 0 : index
    %180 = vector.load %arg7[%c8_187, %c0_188, %c0_189] : memref<9x1x9xf32, #tpu.memory_space<vmem>>, vector<1x1x9xf32>
    %181 = vector.shape_cast %180 : vector<1x1x9xf32> to vector<1x9xf32>
    %cst_190 = arith.constant dense<0.000000e+00> : vector<1x64xf32>
    %182 = tpu.matmul %181, %124, %cst_190 {dimension_numbers = #tpu.dot_dimension_numbers<[1], [0], [0], [1], [0, 0, 1, 1], [], []>} : vector<1x9xf32>, vector<9x64xf32>, vector<1x64xf32> -> vector<1x64xf32>
    %c8_191 = arith.constant 8 : index
    %c0_192 = arith.constant 0 : index
    %c0_193 = arith.constant 0 : index
    %183 = vector.load %arg8[%c8_191, %c0_192, %c0_193] : memref<9x64x64xf32, #tpu.memory_space<vmem>>, vector<1x64x64xf32>
    %184 = vector.shape_cast %183 : vector<1x64x64xf32> to vector<64x64xf32>
    %cst_194 = arith.constant dense<0.000000e+00> : vector<1x64xf32>
    %185 = tpu.matmul %182, %184, %cst_194 {dimension_numbers = #tpu.dot_dimension_numbers<[1], [0], [0], [1], [0, 0, 1, 1], [], []>} : vector<1x64xf32>, vector<64x64xf32>, vector<1x64xf32> -> vector<1x64xf32>
    %186 = arith.addf %179, %185 : vector<1x64xf32>
    %c0_195 = arith.constant 0 : index
    %c0_196 = arith.constant 0 : index
    %187 = vector.load %arg9[%c0_195, %c0_196] : memref<1x64xf32, #tpu.memory_space<vmem>>, vector<1x64xf32>
    %188 = arith.addf %186, %187 : vector<1x64xf32>
    %cst_197 = arith.constant 0.000000e+00 : f32
    %189 = vector.broadcast %cst_197 : f32 to vector<1x64xf32>
    %190 = arith.maximumf %188, %189 : vector<1x64xf32>
    %c0_198 = arith.constant 0 : index
    %c0_199 = arith.constant 0 : index
    %c0_200 = arith.constant 0 : index
    %191 = vector.load %arg10[%c0_198, %c0_199, %c0_200] : memref<1x64x512xf32, #tpu.memory_space<vmem>>, vector<1x64x512xf32>
    %192 = vector.shape_cast %191 : vector<1x64x512xf32> to vector<64x512xf32>
    %cst_201 = arith.constant dense<0.000000e+00> : vector<1x512xf32>
    %193 = tpu.matmul %190, %192, %cst_201 {dimension_numbers = #tpu.dot_dimension_numbers<[1], [0], [0], [1], [0, 0, 1, 1], [], []>} : vector<1x64xf32>, vector<64x512xf32>, vector<1x512xf32> -> vector<1x512xf32>
    %c0_202 = arith.constant 0 : index
    %c0_203 = arith.constant 0 : index
    %194 = vector.load %arg11[%c0_202, %c0_203] : memref<1x512xf32, #tpu.memory_space<vmem>>, vector<1x512xf32>
    %195 = arith.addf %193, %194 : vector<1x512xf32>
    %cst_204 = arith.constant 0.000000e+00 : f32
    %196 = vector.broadcast %cst_204 : f32 to vector<1x512xf32>
    %197 = arith.maximumf %195, %196 : vector<1x512xf32>
    %c0_205 = arith.constant 0 : index
    %c0_206 = arith.constant 0 : index
    %198 = vector.load %arg12[%c0_205, %c0_206] : memref<512x2xf32, #tpu.memory_space<vmem>>, vector<512x2xf32>
    %cst_207 = arith.constant dense<0.000000e+00> : vector<1x2xf32>
    %199 = tpu.matmul %197, %198, %cst_207 {dimension_numbers = #tpu.dot_dimension_numbers<[1], [0], [0], [1], [0, 0, 1, 1], [], []>} : vector<1x512xf32>, vector<512x2xf32>, vector<1x2xf32> -> vector<1x2xf32>
    %c0_208 = arith.constant 0 : index
    %c0_209 = arith.constant 0 : index
    %200 = vector.load %arg13[%c0_208, %c0_209] : memref<1x2xf32, #tpu.memory_space<vmem>>, vector<1x2xf32>
    %201 = arith.addf %199, %200 : vector<1x2xf32>
    %cst_210 = arith.constant dense<0xFF800000> : vector<1xf32>
    %202 = vector.multi_reduction <maximumf>, %201, %cst_210 [1] : vector<1x2xf32> to vector<1xf32>
    %203 = vector.shape_cast %202 : vector<1xf32> to vector<1x1xf32>
    %204 = vector.broadcast %203 : vector<1x1xf32> to vector<1x2xf32>
    %205 = arith.subf %201, %204 : vector<1x2xf32>
    %206 = math.exp %205 : vector<1x2xf32>
    %cst_211 = arith.constant dense<0.000000e+00> : vector<1xf32>
    %207 = vector.multi_reduction <add>, %206, %cst_211 [1] : vector<1x2xf32> to vector<1xf32>
    %208 = vector.shape_cast %207 : vector<1xf32> to vector<1x1xf32>
    %209 = vector.broadcast %208 : vector<1x1xf32> to vector<1x2xf32>
    %210 = arith.divf %206, %209 : vector<1x2xf32>
    %c0_212 = arith.constant 0 : index
    %c0_213 = arith.constant 0 : index
    %c0_214 = arith.constant 0 : index
    %211 = vector.load %arg14[%c0_212, %c0_213, %c0_214] : memref<1x1x2xf32, #tpu.memory_space<vmem>>, vector<1x1x2xf32>
    %212 = vector.shape_cast %211 : vector<1x1x2xf32> to vector<1x2xf32>
    %213 = vector.shape_cast %210 : vector<1x2xf32> to vector<1x1x2xf32>
    tpu.vector_store %arg14[%c0_212, %c0_213, %c0_214], %213 {strides = array<i32>} : memref<1x1x2xf32, #tpu.memory_space<vmem>>, vector<1x1x2xf32>,
    return
  }
  func.func @transform_0(%arg0: i32) -> (i32, i32, i32) {
    %c0_i32 = arith.constant 0 : i32
    %c0_i32_0 = arith.constant 0 : i32
    %c0_i32_1 = arith.constant 0 : i32
    return %arg0, %c0_i32, %c0_i32_0 : i32, i32, i32
  }
  func.func @transform_1(%arg0: i32) -> (i32, i32) {
    %c0_i32 = arith.constant 0 : i32
    %c0_i32_0 = arith.constant 0 : i32
    %c0_i32_1 = arith.constant 0 : i32
    return %c0_i32, %c0_i32_0 : i32, i32
  }
  func.func @transform_2(%arg0: i32) -> (i32, i32) {
    %c0_i32 = arith.constant 0 : i32
    %c0_i32_0 = arith.constant 0 : i32
    %c0_i32_1 = arith.constant 0 : i32
    return %c0_i32, %c0_i32_0 : i32, i32
  }
  func.func @transform_3(%arg0: i32) -> (i32, i32, i32) {
    %c0_i32 = arith.constant 0 : i32
    %c0_i32_0 = arith.constant 0 : i32
    %c0_i32_1 = arith.constant 0 : i32
    %c0_i32_2 = arith.constant 0 : i32
    return %c0_i32, %c0_i32_0, %c0_i32_1 : i32, i32, i32
  }
  func.func @transform_4(%arg0: i32) -> (i32, i32, i32) {
    %c0_i32 = arith.constant 0 : i32
    %c0_i32_0 = arith.constant 0 : i32
    %c0_i32_1 = arith.constant 0 : i32
    %c0_i32_2 = arith.constant 0 : i32
    return %c0_i32, %c0_i32_0, %c0_i32_1 : i32, i32, i32
  }
  func.func @transform_5(%arg0: i32) -> (i32, i32) {
    %c0_i32 = arith.constant 0 : i32
    %c0_i32_0 = arith.constant 0 : i32
    %c0_i32_1 = arith.constant 0 : i32
    return %c0_i32, %c0_i32_0 : i32, i32
  }
  func.func @transform_6(%arg0: i32) -> (i32, i32, i32) {
    %c0_i32 = arith.constant 0 : i32
    %c0_i32_0 = arith.constant 0 : i32
    %c0_i32_1 = arith.constant 0 : i32
    %c0_i32_2 = arith.constant 0 : i32
    return %c0_i32, %c0_i32_0, %c0_i32_1 : i32, i32, i32
  }
  func.func @transform_7(%arg0: i32) -> (i32, i32, i32) {
    %c0_i32 = arith.constant 0 : i32
    %c0_i32_0 = arith.constant 0 : i32
    %c0_i32_1 = arith.constant 0 : i32
    %c0_i32_2 = arith.constant 0 : i32
    return %c0_i32, %c0_i32_0, %c0_i32_1 : i32, i32, i32
  }
  func.func @transform_8(%arg0: i32) -> (i32, i32) {
    %c0_i32 = arith.constant 0 : i32
    %c0_i32_0 = arith.constant 0 : i32
    %c0_i32_1 = arith.constant 0 : i32
    return %c0_i32, %c0_i32_0 : i32, i32
  }
  func.func @transform_9(%arg0: i32) -> (i32, i32, i32) {
    %c0_i32 = arith.constant 0 : i32
    %c0_i32_0 = arith.constant 0 : i32
    %c0_i32_1 = arith.constant 0 : i32
    %c0_i32_2 = arith.constant 0 : i32
    return %c0_i32, %c0_i32_0, %c0_i32_1 : i32, i32, i32
  }
  func.func @transform_10(%arg0: i32) -> (i32, i32) {
    %c0_i32 = arith.constant 0 : i32
    %c0_i32_0 = arith.constant 0 : i32
    %c0_i32_1 = arith.constant 0 : i32
    return %c0_i32, %c0_i32_0 : i32, i32
  }
  func.func @transform_11(%arg0: i32) -> (i32, i32) {
    %c0_i32 = arith.constant 0 : i32
    %c0_i32_0 = arith.constant 0 : i32
    %c0_i32_1 = arith.constant 0 : i32
    return %c0_i32, %c0_i32_0 : i32, i32
  }
  func.func @transform_12(%arg0: i32) -> (i32, i32) {
    %c0_i32 = arith.constant 0 : i32
    %c0_i32_0 = arith.constant 0 : i32
    %c0_i32_1 = arith.constant 0 : i32
    return %c0_i32, %c0_i32_0 : i32, i32
  }
  func.func @transform_13(%arg0: i32) -> (i32, i32, i32) {
    %c0_i32 = arith.constant 0 : i32
    %c0_i32_0 = arith.constant 0 : i32
    %c0_i32_1 = arith.constant 0 : i32
    return %arg0, %c0_i32, %c0_i32_0 : i32, i32, i32
  }
}

</mosaic_0001>

<bundles_post_ra>
// kernel: vpg_p_forward.1
= control target key start
LH: loop header
LB: loop body
LE: loop exit
PB: predicated region body
PF: predicated region fallthrough
CT: control target
= control target key end

     0   :  { %18 = vsyncpa [#allocation3], 0  ;;  %s4317_s0 = inlined_call_operand.vmem [shape: f32[2,64,256], index: 0, kind: input, shape index: {}]   ;;  %s4318_s1 = inlined_call_operand.vmem [shape: f32[256,32], index: 1, kind: input, shape index: {}]   ;;  %s4319_s2 = inlined_call_operand.vmem [shape: f32[1,32], index: 2, kind: input, shape index: {}]   ;;  %s4320_s3 = inlined_call_operand.vmem [shape: f32[16,9,64], index: 3, kind: input, shape index: {}]   ;;  %s4321_s4 = inlined_call_operand.vmem [shape: f32[16,32,64], index: 4, kind: input, shape index: {}]   ;;  %s4322_s5 = inlined_call_operand.vmem [shape: f32[1,64], index: 5, kind: input, shape index: {}]   ;;  %s4323_s6 = inlined_call_operand.vmem [shape: f32[9,1,9], index: 6, kind: input, shape index: {}]   ;;  %s4324_s7 = inlined_call_operand.vmem [shape: f32[9,64,64], index: 7, kind: input, shape index: {}]   ;;  %s4325_s8 = inlined_call_operand.vmem [shape: f32[1,64], index: 8, kind: input, shape index: {}]   ;;  %s4326_s9 = inlined_call_operand.vmem [shape: f32[1,64,512], index: 9, kind: input, shape index: {}]   ;;  %s4327_s10 = inlined_call_operand.vmem [shape: f32[1,512], index: 10, kind: input, shape index: {}]   ;;  %s4328_s11 = inlined_call_operand.vmem [shape: f32[512,2], index: 11, kind: input, shape index: {}]   ;;  %s4329_s12 = inlined_call_operand.vmem [shape: f32[1,2], index: 12, kind: input, shape index: {}]   ;;  %s4330_s13 = inlined_call_operand.hbm [shape: f32[2,1,2], index: 13, kind: output, shape index: {}]  }
   0x1   :  { %20 = vsyncpa [#allocation3 + $0x1], 0  ;;  %s3011_s25 = smov 0   ;;  %s3013_s26 = smov 0  }
   0x2   :  { %s3015_s27 = smov 0   ;;  %s3017_s28 = smov 0  }
   0x3 LB: > { %4335 = sst [smem:[#allocation5_spill]] %s2935_s27  ;;  %s3032_s29 = sadd.s32 4294967295, %s2939_s28   ;;  %s2939_s28 = sphi %s3017_s28, %s4342_s28   ;;  %s2935_s27 = sphi %s3015_s27, %s4344_s27   ;;  %s2931_s26 = sphi %s3013_s26, %s4346_s26   ;;  %s2927_s25 = sphi %s3011_s25, %s4345_s25  }
   0x4   : > { %s2566_s30 = sadd.s32 4294967294, %s2939_s28   ;;  %s3036_s14 = sadd.s32 1, %s2939_s28  }
   0x5   : > { %4336 = sst [smem:[#allocation6_spill]] %s3036_s14  ;;  %s311_s15 = sadd.s32 1, %s2935_s27 }
   0x6   : > { %s308_s16 = ssub.s32 %s2939_s28, %s3036_s14  ;;  %p321_p0 = scmp.ne.s32.totalorder %s2935_s27, %s2931_s26 }
   0x7   : > { %p309_p1 = scmp.eq.s32.totalorder %s308_s16, 0  ;;  %p322_p2 = scmp.eq.s32.totalorder %s3032_s29, 1 }
   0x8   : > { %p327_p3 = scmp.ne.s32.totalorder %s2931_s26, %s2927_s25  ;;  %p328_p4 = scmp.eq.s32.totalorder %s2566_s30, 1 }
   0x9   : > { %s3047_s17 = scalar_select %p309_p1, %s2935_s27, %s311_s15  }
   0xa   : > { %p3049_p5 = por %p322_p2, %p321_p0  ;;  %p3053_p6 = por %p328_p4, %p327_p3 }
   0xb   : > { %4337 = sst [smem:[#allocation7_spill]] %s3047_s17  ;;  %p2569_p7 = scmp.ge.s32.totalorder %s2939_s28, 1 }
   0xc   : > { %s4339_s19 = scalar_select %p3053_p6, 1, 0 }
   0xd   : > { %p390_p8 = scmp.lt.s32.totalorder %s2939_s28, 3 }
   0xe   : > { %4340 = sst [smem:[#allocation8_spill]] %s4339_s19 }
   0xf   : > { %p391_p9 = pnand %p2569_p7, %p390_p8 }
  0x10   : > { %p433_p10 = scmp.lt.s32.totalorder (!%p391_p9), %s3032_s29, 1  ;;  %s431_s20 = sand.u32 (!%p391_p9), 1, %s2931_s26  }
  0x11   : > { %394 = sbr.rel (%p391_p9) target bundleno = 1893 (0x765), region = 72  ;;  %s432_s14 = scalar_lea.vmem (!%p391_p9), [#allocation2], %s431_s20 }
  0x12   : > { %s2509_s30 = sshll.u32 (!%p391_p9), %s432_s14, 4  ;;  %s2499_s16 = scalar_lea.sflag (!%p391_p9), [#allocation3], %s431_s20  ;;  %s2510_s30 = int_to_ptr.vmem [resolvable:$true] %s2509_s30 }
  0x13   : > { %s2897_s17 = scalar_lea.hbm (!%p391_p9), %s4330_s13, 2 }
  0x16   : > { %v469_v0 = vld [vmem:[%s4318_s1 + $0x78] sm:$0xff]  ;;  %v468_v1 = vld [vmem:[%s4318_s1 + $0x70] sm:$0xff]  ;;  %v467_v4 = vld [vmem:[%s4318_s1 + $0x68] sm:$0xff]  ;;  %s434_s24 = scalar_select %p433_p10, %s3032_s29, 1  ;;  %vm582_vm0 = vcmask 523264   ;;  %vm653_vm1 = vcmask 261120  }
  0x17   : > { %v485_v2 = vld [vmem:[%s4318_s1 + $0xf8] sm:$0xff]  ;;  %490 = vmatpush.msra.mxu0 %v469_v0  ;;  %v484_v3 = vld [vmem:[%s4318_s1 + $0xf0] sm:$0xff]  ;;  %v483_v5 = vld [vmem:[%s4318_s1 + $0xe8] sm:$0xff]  ;;  %vm1677_vm2 = vcmask 1040384   ;;  %vm1673_vm3 = vcmask 72704   ;;  %vm2472_vm4 = vcmask 8192  }
  0x18   : > { %531 = vmatpush.msra.mxu1 %v485_v2  ;;  %v466_v6 = vld [vmem:[%s4318_s1 + $0x60] sm:$0xff]  ;;  %v465_v8 = vld [vmem:[%s4318_s1 + $0x58] sm:$0xff]  ;;  %v464_v10 = vld [vmem:[%s4318_s1 + $0x50] sm:$0xff]  ;;  %s2831_s23 = sshll.u32 %s434_s24, 7  ;;  %s2507_s24 = scalar_lea.hbm %s4330_s13, %s3032_s29 }
  0x19   : > { %491 = vmatpush.msra.mxu0 %v468_v1  ;;  %v482_v7 = vld [vmem:[%s4318_s1 + $0xe0] sm:$0xff]  ;;  %v481_v9 = vld [vmem:[%s4318_s1 + $0xd8] sm:$0xff]  ;;  %v480_v11 = vld [vmem:[%s4318_s1 + $0xd0] sm:$0xff]  ;;  %s3154_s19 = scalar_lea.vmem %s4317_s0, %s2831_s23  ;;  %s2511_s15 = sshll.u32 %s2507_s24, 4  ;;  %s2512_s15 = int_to_ptr.hbm [resolvable:$true] %s2511_s15 }
  0x1a   : > { %532 = vmatpush.msra.mxu1 %v484_v3  ;;  %v463_v12 = vld [vmem:[%s4318_s1 + $0x48] sm:$0xff]  ;;  %v462_v14 = vld [vmem:[%s4318_s1 + $0x40] sm:$0xff]  ;;  %v461_v16 = vld [vmem:[%s4318_s1 + $0x38] sm:$0xff]  ;;  %s2891_s23 = sshra.s32 %s2512_s15, 4  ;;  %s2892_s23 = int_to_ptr.hbm [resolvable:$true] %s2891_s23 }
  0x1b   : > { %492 = vmatpush.msra.mxu0 %v467_v4  ;;  %v479_v13 = vld [vmem:[%s4318_s1 + $0xc8] sm:$0xff]  ;;  %v478_v15 = vld [vmem:[%s4318_s1 + $0xc0] sm:$0xff]  ;;  %v477_v17 = vld [vmem:[%s4318_s1 + $0xb8] sm:$0xff]  ;;  %s2893_s29 = scalar_lea.hbm %s2892_s23, 1  ;;  %p2898_p0 = scmp.lt.s32.totalorder %s2892_s23, %s4330_s13 }
  0x1c   : > { %533 = vmatpush.msra.mxu1 %v483_v5  ;;  %v460_v18 = vld [vmem:[%s4318_s1 + $0x30] sm:$0xff]  ;;  %v459_v20 = vld [vmem:[%s4318_s1 + $0x28] sm:$0xff]  ;;  %v458_v22 = vld [vmem:[%s4318_s1 + $0x20] sm:$0xff]  ;;  %p2894_p11 = scmp.ne.s32.totalorder %s2892_s23, %s2893_s29  ;;  %p2899_p1 = scmp.lt.s32.totalorder %s2897_s17, %s2893_s29 }
  0x1d   : > { %493 = vmatpush.msra.mxu0 %v466_v6  ;;  %v476_v19 = vld [vmem:[%s4318_s1 + $0xb0] sm:$0xff]  ;;  %v475_v21 = vld [vmem:[%s4318_s1 + $0xa8] sm:$0xff]  ;;  %v474_v23 = vld [vmem:[%s4318_s1 + $0xa0] sm:$0xff] }
  0x1e   : > { %534 = vmatpush.msra.mxu1 %v482_v7  ;;  %v457_v24 = vld [vmem:[%s4318_s1 + $0x18] sm:$0xff]  ;;  %v456_v26 = vld [vmem:[%s4318_s1 + $0x10] sm:$0xff]  ;;  %v455_v28 = vld [vmem:[%s4318_s1 + $0x8] sm:$0xff]  ;;  %p2895_p12 = pnand %p2894_p11, %p3049_p5  ;;  %p2900_p2 = por %p2899_p1, %p2898_p0 }
  0x1f   : > { %494 = vmatpush.msra.mxu0 %v465_v8  ;;  %v473_v25 = vld [vmem:[%s4318_s1 + $0x98] sm:$0xff]  ;;  %v472_v27 = vld [vmem:[%s4318_s1 + $0x90] sm:$0xff]  ;;  %v471_v29 = vld [vmem:[%s4318_s1 + $0x88] sm:$0xff] }
  0x20   : > { %535 = vmatpush.msra.mxu1 %v481_v9  ;;  %v454_v30 = vld [vmem:[%s4318_s1] sm:$0xff]  ;;  %v439_v33 = vld [vmem:[%s3154_s19 + $0x8] sm:$0xff]  ;;  %v440_v34 = vld [vmem:[%s3154_s19 + $0x10] sm:$0xff]  ;;  %p2896_p13 = pneg %p2895_p12 }
  0x21   : > { %495 = vmatpush.msra.mxu0 %v464_v10  ;;  %v470_v31 = vld [vmem:[%s4318_s1 + $0x80] sm:$0xff]  ;;  %v441_v35 = vld [vmem:[%s3154_s19 + $0x18] sm:$0xff]  ;;  %v443_v37 = vld [vmem:[%s3154_s19 + $0x28] sm:$0xff] }
  0x22   : > { %536 = vmatpush.msra.mxu1 %v480_v11  ;;  %v438_v32 = vld [vmem:[%s3154_s19] sm:$0xff]  ;;  %v444_v38 = vld [vmem:[%s3154_s19 + $0x30] sm:$0xff]  ;;  %v445_v39 = vld [vmem:[%s3154_s19 + $0x38] sm:$0xff]  ;;  %p2901_p3 = pnand %p2900_p2, %p2896_p13 }
  0x23   : > { %496 = vmatpush.msra.mxu0 %v463_v12  ;;  %v442_v36 = vld [vmem:[%s3154_s19 + $0x20] sm:$0xff]  ;;  %v447_v41 = vld [vmem:[%s3154_s19 + $0x48] sm:$0xff]  ;;  %v448_v42 = vld [vmem:[%s3154_s19 + $0x50] sm:$0xff] }
  0x24   : > { %537 = vmatpush.msra.mxu1 %v479_v13  ;;  %v446_v40 = vld [vmem:[%s3154_s19 + $0x40] sm:$0xff]  ;;  %v449_v43 = vld [vmem:[%s3154_s19 + $0x58] sm:$0xff]  ;;  %v451_v45 = vld [vmem:[%s3154_s19 + $0x68] sm:$0xff] }
  0x25   : > { %497 = vmatpush.msra.mxu0 %v462_v14  ;;  %v450_v44 = vld [vmem:[%s3154_s19 + $0x60] sm:$0xff]  ;;  %v452_v46 = vld [vmem:[%s3154_s19 + $0x70] sm:$0xff]  ;;  %v453_v47 = vld [vmem:[%s3154_s19 + $0x78] sm:$0xff] }
  0x26   : > { %538 = vmatpush.msra.mxu1 %v478_v15  ;;  %v2871_v62 = vld [vmem:[%s4319_s2] ss:$0 sm:$0xff] }
  0x27   : > { %498 = vmatpush.msra.mxu0 %v461_v16 }
  0x28   : > { %539 = vmatpush.msra.mxu1 %v477_v17 }
  0x29   : > { %499 = vmatpush.msra.mxu0 %v460_v18 }
  0x2a   : > { %540 = vmatpush.msra.mxu1 %v476_v19 }
  0x2b   : > { %500 = vmatpush.msra.mxu0 %v459_v20 }
  0x2c   : > { %541 = vmatpush.msra.mxu1 %v475_v21 }
  0x2d   : > { %501 = vmatpush.msra.mxu0 %v458_v22 }
  0x2e   : > { %542 = vmatpush.msra.mxu1 %v474_v23 }
  0x2f   : > { %502 = vmatpush.msra.mxu0 %v457_v24 }
  0x30   : > { %543 = vmatpush.msra.mxu1 %v473_v25  ;;  %v580_v25 = vld [vmem:[%s4320_s3] sm:$0xff] }
  0x31   : > { %503 = vmatpush.msra.mxu0 %v456_v26  ;;  %v2574_v26 = vld [vmem:[%s4320_s3 + $0x10] sm:$0xff] }
  0x32   : > { %544 = vmatpush.msra.mxu1 %v472_v27  ;;  %v2581_v27 = vld [vmem:[%s4321_s4 + $0x38] sm:$0xff] }
  0x33   : > { %504 = vmatpush.msra.mxu0 %v455_v28  ;;  %v2580_v28 = vld [vmem:[%s4321_s4 + $0x30] sm:$0xff] }
  0x34   : > { %545 = vmatpush.msra.mxu1 %v471_v29  ;;  %v2616_v29 = vld [vmem:[%s4320_s3 + $0x50] sm:$0xff] }
  0x35   : > { %505 = vmatpush.msra.mxu0 %v454_v30  ;;  %v2579_v30 = vld [vmem:[%s4321_s4 + $0x28] sm:$0xff] }
  0x36   : > { %546 = vmatpush.msra.mxu1 %v470_v31  ;;  %506 = vmatmul.f32.vlgmr.msra.gmra.mxu0 %v438_v32  ;;  %v2578_v31 = vld [vmem:[%s4321_s4 + $0x20] sm:$0xff]  ;;  %v581_v32 = vld [vmem:[%s4320_s3 + $0x8] sm:$0x1] }
  0x37   : > { %547 = vmatmul.f32.vlgmr.msra.gmra.mxu1 %v439_v33  ;;  %v2575_v33 = vld [vmem:[%s4320_s3 + $0x18] sm:$0x1] }
  0x3e   : > { %509 = vmatmul.f32.gmra.mxu0 %v440_v34  ;;  %v2617_v34 = vld [vmem:[%s4320_s3 + $0x58] sm:$0x1] }
  0x3f   : > { %550 = vmatmul.f32.gmra.mxu1 %v441_v35  ;;  %v2636_v35 = vld [vmem:[%s4320_s3 + $0x70] sm:$0xff] }
  0x46   : > { %512 = vmatmul.f32.gmra.mxu0 %v442_v36  ;;  %v2637_v36 = vld [vmem:[%s4320_s3 + $0x78] sm:$0x1] }
  0x47   : > { %553 = vmatmul.f32.gmra.mxu1 %v443_v37  ;;  %v2656_v37 = vld [vmem:[%s4320_s3 + $0x90] sm:$0xff] }
  0x4e   : > { %515 = vmatmul.f32.gmra.mxu0 %v444_v38  ;;  %v2657_v38 = vld [vmem:[%s4320_s3 + $0x98] sm:$0x1] }
  0x4f   : > { %556 = vmatmul.f32.gmra.mxu1 %v445_v39  ;;  %v615_v39 = vld [vmem:[%s4321_s4 + $0x18] sm:$0xff] }
  0x56   : > { %518 = vmatmul.f32.gmra.mxu0 %v446_v40  ;;  %v614_v40 = vld [vmem:[%s4321_s4 + $0x10] sm:$0xff] }
  0x57   : > { %559 = vmatmul.f32.gmra.mxu1 %v447_v41  ;;  %v613_v41 = vld [vmem:[%s4321_s4 + $0x8] sm:$0xff] }
  0x5e   : > { %521 = vmatmul.f32.gmra.mxu0 %v448_v42  ;;  %v2676_v42 = vld [vmem:[%s4320_s3 + $0xb0] sm:$0xff] }
  0x5f   : > { %562 = vmatmul.f32.gmra.mxu1 %v449_v43  ;;  %v612_v43 = vld [vmem:[%s4321_s4] sm:$0xff] }
  0x66   : > { %524 = vmatmul.f32.gmra.mxu0 %v450_v44 }
  0x67   : > { %565 = vmatmul.f32.gmra.mxu1 %v451_v45 }
  0x6e   : > { %527 = vmatmul.f32.gmra.mxu0 %v452_v46 }
  0x6f   : > { %568 = vmatmul.f32.gmra.mxu1 %v453_v47 }
  0xb3   : > { %v507_v48 = vpop.f32.mrf.mxu0 }
  0xb4   : > { %v548_v49 = vpop.f32.mrf.mxu1  ;;  %v508_v16 = vadd.f32 %v2871_v62, %v507_v48  ;;  %v2586_v48 = vld [vmem:[%s4320_s3 + $0x20] sm:$0xff] }
  0xb6   : > { %v549_v21 = vadd.f32 %v548_v49, %v508_v16  ;;  %v2587_v49 = vld [vmem:[%s4320_s3 + $0x28] sm:$0x1] }
  0xb7   : > { %v2707_v16 = vld [vmem:[%s4320_s3 + $0xe8] sm:$0x1] }
  0xb8   : > { %v3213_v24 = vmax.f32 %v549_v21, 0.0  ;;  %v2620_v21 = vld [vmem:[%s4321_s4 + $0xa0] sm:$0xff] }
  0xbb   : > { %v510_v50 = vpop.f32.mrf.mxu0 }
  0xbc   : > { %v551_v51 = vpop.f32.mrf.mxu1  ;;  %v511_v13 = vadd.f32 %v2871_v62, %v510_v50  ;;  %v2596_v50 = vld [vmem:[%s4320_s3 + $0x30] sm:$0xff] }
  0xbe   : > { %v552_v19 = vadd.f32 %v551_v51, %v511_v13  ;;  %v2597_v51 = vld [vmem:[%s4320_s3 + $0x38] sm:$0x1] }
  0xc0   : > { %v3208_v23 = vmax.f32 %v552_v19, 0.0 }
  0xc3   : > { %v513_v52 = vpop.f32.mrf.mxu0 }
  0xc4   : > { %v554_v53 = vpop.f32.mrf.mxu1  ;;  %v514_v10 = vadd.f32 %v2871_v62, %v513_v52  ;;  %v2606_v52 = vld [vmem:[%s4320_s3 + $0x40] sm:$0xff] }
  0xc6   : > { %v555_v17 = vadd.f32 %v554_v53, %v514_v10  ;;  %v2607_v53 = vld [vmem:[%s4320_s3 + $0x48] sm:$0x1]  ;;  %v2602_v10 = vld [vmem:[%s4321_s4 + $0x70] sm:$0xff] }
  0xc8   : > { %v3203_v22 = vmax.f32 %v555_v17, 0.0 }
  0xcb   : > { %v516_v54 = vpop.f32.mrf.mxu0 }
  0xcc   : > { %v557_v55 = vpop.f32.mrf.mxu1  ;;  %v517_v7 = vadd.f32 %v2871_v62, %v516_v54  ;;  %v2626_v54 = vld [vmem:[%s4320_s3 + $0x60] sm:$0xff] }
  0xce   : > { %v558_v14 = vadd.f32 %v557_v55, %v517_v7  ;;  %v2627_v55 = vld [vmem:[%s4320_s3 + $0x68] sm:$0x1]  ;;  %v2622_v7 = vld [vmem:[%s4321_s4 + $0xb0] sm:$0xff] }
  0xd0   : > { %v3198_v20 = vmax.f32 %v558_v14, 0.0  ;;  %v2600_v14 = vld [vmem:[%s4321_s4 + $0x60] sm:$0xff] }
  0xd3   : > { %v519_v56 = vpop.f32.mrf.mxu0 }
  0xd4   : > { %v560_v57 = vpop.f32.mrf.mxu1  ;;  %v520_v4 = vadd.f32 %v2871_v62, %v519_v56  ;;  %v2646_v56 = vld [vmem:[%s4320_s3 + $0x80] sm:$0xff] }
  0xd6   : > { %v561_v11 = vadd.f32 %v560_v57, %v520_v4  ;;  %v2677_v57 = vld [vmem:[%s4320_s3 + $0xb8] sm:$0x1]  ;;  %v2591_v4 = vld [vmem:[%s4321_s4 + $0x48] sm:$0xff] }
  0xd8   : > { %v3193_v18 = vmax.f32 %v561_v11, 0.0  ;;  %v2706_v11 = vld [vmem:[%s4320_s3 + $0xe0] sm:$0xff] }
  0xdb   : > { %v522_v58 = vpop.f32.mrf.mxu0 }
  0xdc   : > { %v563_v59 = vpop.f32.mrf.mxu1  ;;  %v523_v2 = vadd.f32 %v2871_v62, %v522_v58  ;;  %v2647_v58 = vld [vmem:[%s4320_s3 + $0x88] sm:$0x1] }
  0xde   : > { %v564_v8 = vadd.f32 %v563_v59, %v523_v2  ;;  %v2696_v59 = vld [vmem:[%s4320_s3 + $0xd0] sm:$0xff] }
  0xdf   : > { %v2592_v2 = vld [vmem:[%s4321_s4 + $0x50] sm:$0xff] }
  0xe0   : > { %v3188_v15 = vmax.f32 %v564_v8, 0.0  ;;  %v2687_v8 = vld [vmem:[%s4320_s3 + $0xc8] sm:$0x1] }
  0xe3   : > { %v525_v60 = vpop.f32.mrf.mxu0 }
  0xe4   : > { %v566_v61 = vpop.f32.mrf.mxu1  ;;  %v526_v63 = vadd.f32 %v2871_v62, %v525_v60  ;;  %v2666_v60 = vld [vmem:[%s4320_s3 + $0xa0] sm:$0xff] }
  0xe6   : > { %v567_v5 = vadd.f32 %v566_v61, %v526_v63  ;;  %v2697_v61 = vld [vmem:[%s4320_s3 + $0xd8] sm:$0x1] }
  0xe7   : > { %v2623_v63 = vld [vmem:[%s4321_s4 + $0xb8] sm:$0xff] }
  0xe8   : > { %v3183_v12 = vmax.f32 %v567_v5, 0.0  ;;  %971 = vmatpush.msrb.mxu1 %v2623_v63  ;;  %v2590_v5 = vld [vmem:[%s4321_s4 + $0x40] sm:$0xff] }
  0xea   : > { %972 = vmatpush.msrb.mxu1 %v2622_v7 }
  0xeb   : > { %v528_v0 = vpop.f32.mrf.mxu0 }
  0xec   : > { %v569_v1 = vpop.f32.mrf.mxu1  ;;  %v529_v3 = vadd.f32 %v2871_v62, %v528_v0  ;;  %v2667_v62 = vld [vmem:[%s4320_s3 + $0xa8] sm:$0x1]  ;;  %v2593_v0 = vld [vmem:[%s4321_s4 + $0x58] sm:$0xff] }
  0xee   : > { %v570_v6 = vadd.f32 %v569_v1, %v529_v3  ;;  %v2716_v1 = vld [vmem:[%s4320_s3 + $0xf0] sm:$0xff]  ;;  %v2686_v3 = vld [vmem:[%s4320_s3 + $0xc0] sm:$0xff] }
  0xf0   : > { %v3181_v9 = vmax.f32 %v570_v6, 0.0  ;;  %v2717_v6 = vld [vmem:[%s4320_s3 + $0xf8] sm:$0x1] }
  0xf2   : > { %597 = vmatpush.msra.mxu2 %v3181_v9  ;;  %633 = vmatpush.msra.mxu3 %v3181_v9 }
  0xf3   : > { %933 = vmatpush.msrb.mxu0 %v3181_v9 }
  0xf4   : > { %598 = vmatpush.msra.mxu2 %v3183_v12  ;;  %634 = vmatpush.msra.mxu3 %v3183_v12 }
  0xf5   : > { %934 = vmatpush.msrb.mxu0 %v3183_v12 }
  0xf6   : > { %599 = vmatpush.msra.mxu2 %v3188_v15  ;;  %635 = vmatpush.msra.mxu3 %v3188_v15 }
  0xf7   : > { %935 = vmatpush.msrb.mxu0 %v3188_v15 }
  0xf8   : > { %600 = vmatpush.msra.mxu2 %v3193_v18  ;;  %636 = vmatpush.msra.mxu3 %v3193_v18 }
  0xf9   : > { %936 = vmatpush.msrb.mxu0 %v3193_v18 }
  0xfa   : > { %601 = vmatpush.msra.mxu2 %v3198_v20  ;;  %637 = vmatpush.msra.mxu3 %v3198_v20 }
  0xfb   : > { %937 = vmatpush.msrb.mxu0 %v3198_v20 }
  0xfc   : > { %602 = vmatpush.msra.mxu2 %v3203_v22  ;;  %638 = vmatpush.msra.mxu3 %v3203_v22 }
  0xfd   : > { %938 = vmatpush.msrb.mxu0 %v3203_v22 }
  0xfe   : > { %603 = vmatpush.msra.mxu2 %v3208_v23  ;;  %639 = vmatpush.msra.mxu3 %v3208_v23 }
  0xff   : > { %939 = vmatpush.msrb.mxu0 %v3208_v23 }
 0x100   : > { %604 = vmatpush.msra.mxu2 %v3213_v24  ;;  %640 = vmatpush.msra.mxu3 %v3213_v24 }
 0x101   : > { %940 = vmatpush.msrb.mxu0 %v3213_v24  ;;  %2572 = vmatmul.msk.f32.vlgmr.msra.gmra.mxu2 %vm582_vm0, %v580_v25 }
 0x102   : > { %2576 = vmatmul.msk.f32.vlgmr.msra.gmra.mxu3 %vm582_vm0, %v2574_v26  ;;  %672 = vmatpush.msrb.mxu2 %v2581_v27  ;;  %v2633_v26 = vld [vmem:[%s4321_s4 + $0xd8] sm:$0xff] }
 0x103   : > { %1069 = vmatpush.msra.mxu0 %v3181_v9  ;;  %701 = vmatpush.msrb.mxu3 %v615_v39 }
 0x104   : > { %673 = vmatpush.msrb.mxu2 %v2580_v28  ;;  %2618 = vmatmul.msk.f32.vlgmr.msrb.gmra.mxu0 %vm582_vm0, %v2616_v29  ;;  %v2632_v29 = vld [vmem:[%s4321_s4 + $0xd0] sm:$0xff] }
 0x105   : > { %1070 = vmatpush.msra.mxu0 %v3183_v12  ;;  %702 = vmatpush.msrb.mxu3 %v614_v40 }
 0x106   : > { %674 = vmatpush.msrb.mxu2 %v2579_v30  ;;  %v2643_v30 = vld [vmem:[%s4321_s4 + $0xf8] sm:$0xff] }
 0x107   : > { %1071 = vmatpush.msra.mxu0 %v3188_v15  ;;  %703 = vmatpush.msrb.mxu3 %v613_v41  ;;  %v2652_v41 = vld [vmem:[%s4321_s4 + $0x110] sm:$0xff] }
 0x108   : > { %675 = vmatpush.msrb.mxu2 %v2578_v31  ;;  %v2642_v31 = vld [vmem:[%s4321_s4 + $0xf0] sm:$0xff] }
 0x109   : > { %1072 = vmatpush.msra.mxu0 %v3193_v18  ;;  %2573 = vmatmul.msk.f32.gmra.mxu2 %vm582_vm0, %v581_v32  ;;  %v2631_v32 = vld [vmem:[%s4321_s4 + $0xc8] sm:$0xff] }
 0x10a   : > { %729 = vmatpush.msra.mxu2 %v3181_v9  ;;  %2577 = vmatmul.msk.f32.gmra.mxu3 %vm582_vm0, %v2575_v33  ;;  %v2641_v33 = vld [vmem:[%s4321_s4 + $0xe8] sm:$0xff] }
 0x10b   : > { %1073 = vmatpush.msra.mxu0 %v3198_v20  ;;  %704 = vmatpush.msrb.mxu3 %v612_v43  ;;  %v2662_v43 = vld [vmem:[%s4321_s4 + $0x130] sm:$0xff] }
 0x10c   : > { %730 = vmatpush.msra.mxu2 %v3183_v12  ;;  %2619 = vmatmul.msk.f32.gmra.mxu0 %vm582_vm0, %v2617_v34  ;;  %v2630_v34 = vld [vmem:[%s4321_s4 + $0xc0] sm:$0xff] }
 0x10d   : > { %1074 = vmatpush.msra.mxu0 %v3203_v22  ;;  %767 = vmatpush.msra.mxu3 %v2593_v0 }
 0x10e   : > { %731 = vmatpush.msra.mxu2 %v3188_v15 }
 0x10f   : > { %1075 = vmatpush.msra.mxu0 %v3208_v23  ;;  %768 = vmatpush.msra.mxu3 %v2592_v2  ;;  %v2703_v2 = vld [vmem:[%s4321_s4 + $0x1b8] sm:$0xff] }
 0x110   : > { %732 = vmatpush.msra.mxu2 %v3193_v18 }
 0x111   : > { %1076 = vmatpush.msra.mxu0 %v3213_v24  ;;  %769 = vmatpush.msra.mxu3 %v2591_v4  ;;  %v2691_v4 = vld [vmem:[%s4321_s4 + $0x188] sm:$0xff] }
 0x112   : > { %733 = vmatpush.msra.mxu2 %v3198_v20 }
 0x113   : > { %1205 = vmatpush.msrb.mxu0 %v3181_v9  ;;  %770 = vmatpush.msra.mxu3 %v2590_v5  ;;  %v2701_v5 = vld [vmem:[%s4321_s4 + $0x1a8] sm:$0xff] }
 0x114   : > { %734 = vmatpush.msra.mxu2 %v3203_v22  ;;  %2638 = vmatmul.msk.f32.vlgmr.msra.gmra.mxu0 %vm582_vm0, %v2636_v35 }
 0x115   : > { %1206 = vmatpush.msrb.mxu0 %v3183_v12 }
 0x116   : > { %735 = vmatpush.msra.mxu2 %v3208_v23 }
 0x117   : > { %1207 = vmatpush.msrb.mxu0 %v3188_v15 }
 0x118   : > { %736 = vmatpush.msra.mxu2 %v3213_v24 }
 0x119   : > { %1208 = vmatpush.msrb.mxu0 %v3193_v18 }
 0x11b   : > { %1209 = vmatpush.msrb.mxu0 %v3198_v20 }
 0x11c   : > { %2639 = vmatmul.msk.f32.gmra.mxu0 %vm582_vm0, %v2637_v36 }
 0x11d   : > { %1210 = vmatpush.msrb.mxu0 %v3203_v22 }
 0x11f   : > { %1211 = vmatpush.msrb.mxu0 %v3208_v23 }
 0x121   : > { %1212 = vmatpush.msrb.mxu0 %v3213_v24 }
 0x123   : > { %1341 = vmatpush.msra.mxu0 %v3181_v9 }
 0x124   : > { %2658 = vmatmul.msk.f32.vlgmr.msrb.gmra.mxu0 %vm582_vm0, %v2656_v37  ;;  %v2640_v37 = vld [vmem:[%s4321_s4 + $0xe0] sm:$0xff] }
 0x125   : > { %1342 = vmatpush.msra.mxu0 %v3183_v12 }
 0x127   : > { %1343 = vmatpush.msra.mxu0 %v3188_v15 }
 0x129   : > { %1344 = vmatpush.msra.mxu0 %v3193_v18 }
 0x12b   : > { %1345 = vmatpush.msra.mxu0 %v3198_v20 }
 0x12c   : > { %2659 = vmatmul.msk.f32.gmra.mxu0 %vm582_vm0, %v2657_v38  ;;  %v2653_v38 = vld [vmem:[%s4321_s4 + $0x118] sm:$0xff] }
 0x12d   : > { %1346 = vmatpush.msra.mxu0 %v3203_v22 }
 0x12f   : > { %1347 = vmatpush.msra.mxu0 %v3208_v23 }
 0x131   : > { %1348 = vmatpush.msra.mxu0 %v3213_v24 }
 0x133   : > { %1477 = vmatpush.msrb.mxu0 %v3181_v9 }
 0x134   : > { %2678 = vmatmul.msk.f32.vlgmr.msra.gmra.mxu0 %vm582_vm0, %v2676_v42  ;;  %v2663_v42 = vld [vmem:[%s4321_s4 + $0x138] sm:$0xff] }
 0x135   : > { %1478 = vmatpush.msrb.mxu0 %v3183_v12 }
 0x137   : > { %1479 = vmatpush.msrb.mxu0 %v3188_v15 }
 0x139   : > { %1480 = vmatpush.msrb.mxu0 %v3193_v18 }
 0x13b   : > { %1481 = vmatpush.msrb.mxu0 %v3198_v20 }
 0x13c   : > { %2679 = vmatmul.msk.f32.gmra.mxu0 %vm582_vm0, %v2677_v57  ;;  %v2681_v57 = vld [vmem:[%s4321_s4 + $0x168] sm:$0xff] }
 0x13d   : > { %1482 = vmatpush.msrb.mxu0 %v3203_v22 }
 0x13f   : > { %1483 = vmatpush.msrb.mxu0 %v3208_v23 }
 0x141   : > { %1484 = vmatpush.msrb.mxu0 %v3213_v24 }
 0x143   : > { %1613 = vmatpush.msra.mxu0 %v3181_v9 }
 0x144   : > { %2698 = vmatmul.msk.f32.vlgmr.msrb.gmra.mxu0 %vm582_vm0, %v2696_v59 }
 0x145   : > { %1614 = vmatpush.msra.mxu0 %v3183_v12 }
 0x147   : > { %1615 = vmatpush.msra.mxu0 %v3188_v15 }
 0x149   : > { %1616 = vmatpush.msra.mxu0 %v3193_v18 }
 0x14b   : > { %1617 = vmatpush.msra.mxu0 %v3198_v20 }
 0x14c   : > { %2699 = vmatmul.msk.f32.gmra.mxu0 %vm582_vm0, %v2697_v61  ;;  %v2680_v61 = vld [vmem:[%s4321_s4 + $0x160] sm:$0xff] }
 0x14d   : > { %1618 = vmatpush.msra.mxu0 %v3203_v22 }
 0x14f   : > { %1619 = vmatpush.msra.mxu0 %v3208_v23 }
 0x151   : > { %1620 = vmatpush.msra.mxu0 %v3213_v24 }
 0x154   : > { %2718 = vmatmul.msk.f32.vlgmr.msra.gmra.mxu0 %vm582_vm0, %v2716_v1  ;;  %v2692_v1 = vld [vmem:[%s4321_s4 + $0x190] sm:$0xff] }
 0x15c   : > { %2719 = vmatmul.msk.f32.gmra.mxu0 %vm582_vm0, %v2717_v6  ;;  %v2690_v6 = vld [vmem:[%s4321_s4 + $0x180] sm:$0xff] }
 0x181   : > { %v942_v25 = vpop.f32.mrf.mxu0 }
 0x184   : > { %v606_v44 = vpop.f32.mrf.mxu2 }
 0x185   : > { %v642_v45 = vpop.f32.mrf.mxu3  ;;  %2584 = vmatmul.msk.f32.vlgmr.msrb.gmra.mxu3 %vm653_vm1, %v606_v44  ;;  %v2651_v44 = vld [vmem:[%s4321_s4 + $0x108] sm:$0xff] }
 0x186   : > { %2582 = vmatmul.msk.f32.vlgmr.msrb.gmra.mxu2 %vm653_vm1, %v642_v45  ;;  %v2661_v45 = vld [vmem:[%s4321_s4 + $0x128] sm:$0xff] }
 0x187   : > { %797 = vmatpush.msrb.mxu2 %v3181_v9 }
 0x189   : > { %798 = vmatpush.msrb.mxu2 %v3183_v12  ;;  %v945_v28 = vpop.f32.mrf.mxu0 }
 0x18b   : > { %799 = vmatpush.msrb.mxu2 %v3188_v15 }
 0x18c   : > { %v609_v46 = vpop.f32.mrf.mxu2 }
 0x18d   : > { %800 = vmatpush.msrb.mxu2 %v3193_v18  ;;  %v645_v47 = vpop.f32.mrf.mxu3  ;;  %2585 = vmatmul.msk.f32.gmra.mxu3 %vm653_vm1, %v609_v46  ;;  %v2650_v46 = vld [vmem:[%s4321_s4 + $0x100] sm:$0xff] }
 0x18e   : > { %2583 = vmatmul.msk.f32.gmra.mxu2 %vm653_vm1, %v645_v47 }
 0x18f   : > { %801 = vmatpush.msrb.mxu2 %v3198_v20 }
 0x191   : > { %802 = vmatpush.msrb.mxu2 %v3203_v22  ;;  %v1078_v36 = vpop.f32.mrf.mxu0 }
 0x193   : > { %803 = vmatpush.msrb.mxu2 %v3208_v23 }
 0x195   : > { %804 = vmatpush.msrb.mxu2 %v3213_v24 }
 0x196   : > { %2588 = vmatmul.msk.f32.vlgmr.msra.gmra.mxu2 %vm582_vm0, %v2586_v48 }
 0x197   : > { %865 = vmatpush.msra.mxu2 %v3181_v9 }
 0x199   : > { %866 = vmatpush.msra.mxu2 %v3183_v12  ;;  %v1081_v40 = vpop.f32.mrf.mxu0 }
 0x19b   : > { %867 = vmatpush.msra.mxu2 %v3188_v15 }
 0x19d   : > { %868 = vmatpush.msra.mxu2 %v3193_v18 }
 0x19e   : > { %2589 = vmatmul.msk.f32.gmra.mxu2 %vm582_vm0, %v2587_v49  ;;  %v2660_v49 = vld [vmem:[%s4321_s4 + $0x120] sm:$0xff] }
 0x19f   : > { %869 = vmatpush.msra.mxu2 %v3198_v20 }
 0x1a1   : > { %870 = vmatpush.msra.mxu2 %v3203_v22  ;;  %v1214_v48 = vpop.f32.mrf.mxu0 }
 0x1a3   : > { %871 = vmatpush.msra.mxu2 %v3208_v23 }
 0x1a5   : > { %872 = vmatpush.msra.mxu2 %v3213_v24 }
 0x1a6   : > { %2598 = vmatmul.msk.f32.vlgmr.msrb.gmra.mxu2 %vm582_vm0, %v2596_v50  ;;  %v2673_v50 = vld [vmem:[%s4321_s4 + $0x158] sm:$0xff] }
 0x1a7   : > { %1001 = vmatpush.msrb.mxu2 %v3181_v9 }
 0x1a9   : > { %1002 = vmatpush.msrb.mxu2 %v3183_v12 }
 0x1ab   : > { %1003 = vmatpush.msrb.mxu2 %v3188_v15 }
 0x1ad   : > { %1004 = vmatpush.msrb.mxu2 %v3193_v18 }
 0x1ae   : > { %2599 = vmatmul.msk.f32.gmra.mxu2 %vm582_vm0, %v2597_v51 }
 0x1af   : > { %1005 = vmatpush.msrb.mxu2 %v3198_v20 }
 0x1b1   : > { %1006 = vmatpush.msrb.mxu2 %v3203_v22 }
 0x1b3   : > { %1007 = vmatpush.msrb.mxu2 %v3208_v23 }
 0x1b5   : > { %1008 = vmatpush.msrb.mxu2 %v3213_v24 }
 0x1b6   : > { %2608 = vmatmul.msk.f32.vlgmr.msra.gmra.mxu2 %vm582_vm0, %v2606_v52  ;;  %v1217_v52 = vpop.f32.mrf.mxu0 }
 0x1b7   : > { %1137 = vmatpush.msra.mxu2 %v3181_v9 }
 0x1b9   : > { %1138 = vmatpush.msra.mxu2 %v3183_v12 }
 0x1bb   : > { %1139 = vmatpush.msra.mxu2 %v3188_v15 }
 0x1bd   : > { %1140 = vmatpush.msra.mxu2 %v3193_v18 }
 0x1be   : > { %2609 = vmatmul.msk.f32.gmra.mxu2 %vm582_vm0, %v2607_v53  ;;  %v2672_v53 = vld [vmem:[%s4321_s4 + $0x150] sm:$0xff] }
 0x1bf   : > { %1141 = vmatpush.msra.mxu2 %v3198_v20 }
 0x1c1   : > { %1142 = vmatpush.msra.mxu2 %v3203_v22 }
 0x1c3   : > { %1143 = vmatpush.msra.mxu2 %v3208_v23 }
 0x1c5   : > { %1144 = vmatpush.msra.mxu2 %v3213_v24 }
 0x1c6   : > { %2628 = vmatmul.msk.f32.vlgmr.msrb.gmra.mxu2 %vm582_vm0, %v2626_v54  ;;  %v2683_v54 = vld [vmem:[%s4321_s4 + $0x178] sm:$0xff] }
 0x1c7   : > { %1273 = vmatpush.msrb.mxu2 %v3181_v9 }
 0x1c9   : > { %1274 = vmatpush.msrb.mxu2 %v3183_v12 }
 0x1cb   : > { %1275 = vmatpush.msrb.mxu2 %v3188_v15 }
 0x1cd   : > { %1276 = vmatpush.msrb.mxu2 %v3193_v18 }
 0x1ce   : > { %2629 = vmatmul.msk.f32.gmra.mxu2 %vm582_vm0, %v2627_v55  ;;  %v2682_v55 = vld [vmem:[%s4321_s4 + $0x170] sm:$0xff] }
 0x1cf   : > { %1277 = vmatpush.msrb.mxu2 %v3198_v20 }
 0x1d1   : > { %1278 = vmatpush.msrb.mxu2 %v3203_v22 }
 0x1d3   : > { %1279 = vmatpush.msrb.mxu2 %v3208_v23 }
 0x1d5   : > { %1280 = vmatpush.msrb.mxu2 %v3213_v24 }
 0x1d6   : > { %2648 = vmatmul.msk.f32.vlgmr.msra.gmra.mxu2 %vm582_vm0, %v2646_v56  ;;  %v2671_v56 = vld [vmem:[%s4321_s4 + $0x148] sm:$0xff] }
 0x1d7   : > { %1409 = vmatpush.msra.mxu2 %v3181_v9 }
 0x1d9   : > { %1410 = vmatpush.msra.mxu2 %v3183_v12 }
 0x1db   : > { %1411 = vmatpush.msra.mxu2 %v3188_v15 }
 0x1dd   : > { %1412 = vmatpush.msra.mxu2 %v3193_v18 }
 0x1de   : > { %2649 = vmatmul.msk.f32.gmra.mxu2 %vm582_vm0, %v2647_v58  ;;  %v2670_v58 = vld [vmem:[%s4321_s4 + $0x140] sm:$0xff] }
 0x1df   : > { %1413 = vmatpush.msra.mxu2 %v3198_v20 }
 0x1e1   : > { %1414 = vmatpush.msra.mxu2 %v3203_v22 }
 0x1e3   : > { %1415 = vmatpush.msra.mxu2 %v3208_v23 }
 0x1e5   : > { %1416 = vmatpush.msra.mxu2 %v3213_v24 }
 0x1e6   : > { %2668 = vmatmul.msk.f32.vlgmr.msrb.gmra.mxu2 %vm582_vm0, %v2666_v60  ;;  %v1350_v60 = vpop.f32.mrf.mxu0 }
 0x1e7   : > { %1545 = vmatpush.msrb.mxu2 %v3181_v9  ;;  %v2603_v9 = vld [vmem:[%s4321_s4 + $0x78] sm:$0xff] }
 0x1e8   : > { %835 = vmatpush.msrb.mxu3 %v2603_v9  ;;  %v2700_v9 = vld [vmem:[%s4321_s4 + $0x1a0] sm:$0xff] }
 0x1e9   : > { %1546 = vmatpush.msrb.mxu2 %v3183_v12  ;;  %v2601_v12 = vld [vmem:[%s4321_s4 + $0x68] sm:$0xff] }
 0x1ea   : > { %836 = vmatpush.msrb.mxu3 %v2602_v10  ;;  %v2713_v10 = vld [vmem:[%s4321_s4 + $0x1d8] sm:$0xff] }
 0x1eb   : > { %1547 = vmatpush.msrb.mxu2 %v3188_v15  ;;  %v2621_v15 = vld [vmem:[%s4321_s4 + $0xa8] sm:$0xff] }
 0x1ec   : > { %837 = vmatpush.msrb.mxu3 %v2601_v12  ;;  %973 = vmatpush.msrb.mxu1 %v2621_v15  ;;  %v2723_v15 = vld [vmem:[%s4321_s4 + $0x1f8] sm:$0xff] }
 0x1ed   : > { %1548 = vmatpush.msrb.mxu2 %v3193_v18  ;;  %v2613_v18 = vld [vmem:[%s4321_s4 + $0x98] sm:$0xff] }
 0x1ee   : > { %2669 = vmatmul.msk.f32.gmra.mxu2 %vm582_vm0, %v2667_v62  ;;  %838 = vmatpush.msrb.mxu3 %v2600_v14  ;;  %v2693_v62 = vld [vmem:[%s4321_s4 + $0x198] sm:$0xff]  ;;  %v1353_v0 = vpop.f32.mrf.mxu0  ;;  %v2712_v14 = vld [vmem:[%s4321_s4 + $0x1d0] sm:$0xff] }
 0x1ef   : > { %1549 = vmatpush.msrb.mxu2 %v3198_v20  ;;  %v2612_v20 = vld [vmem:[%s4321_s4 + $0x90] sm:$0xff]  ;;  %974 = vmatpush.msrb.mxu1 %v2620_v21 }
 0x1f0   : > { %2624 = vmatmul.msk.f32.vlgmr.msrb.gmra.mxu1 %vm653_vm1, %v942_v25 }
 0x1f1   : > { %1550 = vmatpush.msrb.mxu2 %v3203_v22  ;;  %v2611_v22 = vld [vmem:[%s4321_s4 + $0x88] sm:$0xff]  ;;  %1107 = vmatpush.msra.mxu1 %v2643_v30 }
 0x1f3   : > { %1551 = vmatpush.msrb.mxu2 %v3208_v23  ;;  %v2610_v23 = vld [vmem:[%s4321_s4 + $0x80] sm:$0xff]  ;;  %1108 = vmatpush.msra.mxu1 %v2642_v31 }
 0x1f5   : > { %1552 = vmatpush.msrb.mxu2 %v3213_v24  ;;  %1109 = vmatpush.msra.mxu1 %v2641_v33 }
 0x1f6   : > { %2688 = vmatmul.msk.f32.vlgmr.msra.gmra.mxu2 %vm582_vm0, %v2686_v3  ;;  %v2702_v3 = vld [vmem:[%s4321_s4 + $0x1b0] sm:$0xff] }
 0x1f7   : > { %1110 = vmatpush.msra.mxu1 %v2640_v37 }
 0x1f8   : > { %2625 = vmatmul.msk.f32.gmra.mxu1 %vm653_vm1, %v945_v28 }
 0x1f9   : > { %1243 = vmatpush.msrb.mxu1 %v2663_v42 }
 0x1fb   : > { %1244 = vmatpush.msrb.mxu1 %v2662_v43 }
 0x1fd   : > { %1245 = vmatpush.msrb.mxu1 %v2661_v45 }
 0x1fe   : > { %2689 = vmatmul.msk.f32.gmra.mxu2 %vm582_vm0, %v2687_v8  ;;  %v1486_v8 = vpop.f32.mrf.mxu0 }
 0x1ff   : > { %1246 = vmatpush.msrb.mxu1 %v2660_v49 }
 0x200   : > { %2644 = vmatmul.msk.f32.vlgmr.msra.gmra.mxu1 %vm653_vm1, %v1078_v36 }
 0x201   : > { %1379 = vmatpush.msra.mxu1 %v2683_v54 }
 0x203   : > { %1380 = vmatpush.msra.mxu1 %v2682_v55 }
 0x205   : > { %1381 = vmatpush.msra.mxu1 %v2681_v57  ;;  %v1707_v57 = vld [vmem:[%s4324_s7 + $0x30] sm:$0xff] }
 0x206   : > { %2708 = vmatmul.msk.f32.vlgmr.msrb.gmra.mxu2 %vm582_vm0, %v2706_v11  ;;  %v1489_v12 = vpop.f32.mrf.mxu0 }
 0x207   : > { %1382 = vmatpush.msra.mxu1 %v2680_v61 }
 0x208   : > { %2645 = vmatmul.msk.f32.gmra.mxu1 %vm653_vm1, %v1081_v40  ;;  %v706_v28 = vpop.f32.mrf.mxu3 }
 0x209   : > { %v3504_v13 = vpop.f32.mrf.mxu2 }
 0x20e   : > { %2709 = vmatmul.msk.f32.gmra.mxu2 %vm582_vm0, %v2707_v16  ;;  %v2722_v16 = vld [vmem:[%s4321_s4 + $0x1f0] sm:$0xff] }
 0x210   : > { %2664 = vmatmul.msk.f32.vlgmr.msrb.gmra.mxu1 %vm653_vm1, %v1214_v48  ;;  %v709_v30 = vpop.f32.mrf.mxu3 }
 0x211   : > { %v3516_v17 = vpop.f32.mrf.mxu2  ;;  %1515 = vmatpush.msrb.mxu1 %v2703_v2  ;;  %v1702_v2 = vld [vmem:[%s4324_s7 + $0x8] sm:$0xff] }
 0x213   : > { %1516 = vmatpush.msrb.mxu1 %v2702_v3 }
 0x215   : > { %1517 = vmatpush.msrb.mxu1 %v2701_v5 }
 0x217   : > { %1518 = vmatpush.msrb.mxu1 %v2700_v9 }
 0x218   : > { %2665 = vmatmul.msk.f32.gmra.mxu1 %vm653_vm1, %v1217_v52 }
 0x219   : > { %v738_v19 = vpop.f32.mrf.mxu2 }
 0x21a   : > { %2594 = vmatmul.msk.f32.vlgmr.msra.gmra.mxu3 %vm653_vm1, %v738_v19  ;;  %v2721_v19 = vld [vmem:[%s4321_s4 + $0x1e8] sm:$0xff] }
 0x21b   : > { %903 = vmatpush.msra.mxu3 %v2613_v18  ;;  %v2711_v18 = vld [vmem:[%s4321_s4 + $0x1c8] sm:$0xff] }
 0x21d   : > { %904 = vmatpush.msra.mxu3 %v2612_v20  ;;  %v2710_v20 = vld [vmem:[%s4321_s4 + $0x1c0] sm:$0xff] }
 0x21f   : > { %905 = vmatpush.msra.mxu3 %v2611_v22  ;;  %v1622_v22 = vpop.f32.mrf.mxu0 }
 0x220   : > { %2684 = vmatmul.msk.f32.vlgmr.msra.gmra.mxu1 %vm653_vm1, %v1350_v60  ;;  %v1705_v60 = vld [vmem:[%s4324_s7 + $0x20] sm:$0xff] }
 0x221   : > { %v741_v24 = vpop.f32.mrf.mxu2  ;;  %906 = vmatpush.msra.mxu3 %v2610_v23  ;;  %1651 = vmatpush.msra.mxu1 %v2723_v15  ;;  %v2720_v23 = vld [vmem:[%s4321_s4 + $0x1e0] sm:$0xff] }
 0x222   : > { %2595 = vmatmul.msk.f32.gmra.mxu3 %vm653_vm1, %v741_v24 }
 0x223   : > { %1652 = vmatpush.msra.mxu1 %v2722_v16 }
 0x225   : > { %1653 = vmatpush.msra.mxu1 %v2721_v19 }
 0x227   : > { %1654 = vmatpush.msra.mxu1 %v2720_v23  ;;  %v1625_v25 = vpop.f32.mrf.mxu0 }
 0x228   : > { %2685 = vmatmul.msk.f32.gmra.mxu1 %vm653_vm1, %v1353_v0  ;;  %v1703_v0 = vld [vmem:[%s4324_s7 + $0x10] sm:$0xff] }
 0x229   : > { %v806_v27 = vpop.f32.mrf.mxu2 }
 0x22a   : > { %2604 = vmatmul.msk.f32.vlgmr.msrb.gmra.mxu3 %vm653_vm1, %v806_v27 }
 0x22b   : > { %1039 = vmatpush.msrb.mxu3 %v2633_v26 }
 0x22d   : > { %1040 = vmatpush.msrb.mxu3 %v2632_v29 }
 0x22f   : > { %1041 = vmatpush.msrb.mxu3 %v2631_v32 }
 0x230   : > { %2704 = vmatmul.msk.f32.vlgmr.msrb.gmra.mxu1 %vm653_vm1, %v1486_v8 }
 0x231   : > { %v809_v35 = vpop.f32.mrf.mxu2  ;;  %1042 = vmatpush.msrb.mxu3 %v2630_v34  ;;  %v707_v34 = vadd.f32 %v706_v28, %v3504_v13 }
 0x232   : > { %2605 = vmatmul.msk.f32.gmra.mxu3 %vm653_vm1, %v809_v35 }
 0x238   : > { %2705 = vmatmul.msk.f32.gmra.mxu1 %vm653_vm1, %v1489_v12 }
 0x239   : > { %v874_v39 = vpop.f32.mrf.mxu2 }
 0x23a   : > { %2614 = vmatmul.msk.f32.vlgmr.msra.gmra.mxu3 %vm653_vm1, %v874_v39  ;;  %v710_v39 = vadd.f32 %v709_v30, %v3516_v17  ;;  %v1708_v17 = vld [vmem:[%s4324_s7 + $0x38] sm:$0xff] }
 0x23b   : > { %1175 = vmatpush.msra.mxu3 %v2653_v38  ;;  %1777 = vmatpush.msrb.mxu1 %v1708_v17  ;;  %v2772_v17 = vld [vmem:[%s4324_s7 + $0x120] sm:$0xff] }
 0x23d   : > { %1176 = vmatpush.msra.mxu3 %v2652_v41  ;;  %1778 = vmatpush.msrb.mxu1 %v1707_v57  ;;  %v2753_v57 = vld [vmem:[%s4323_s6 + $0x3] sm:$0x1] }
 0x23f   : > { %1177 = vmatpush.msra.mxu3 %v2651_v44 }
 0x240   : > { %2724 = vmatmul.msk.f32.vlgmr.msra.gmra.mxu1 %vm653_vm1, %v1622_v22 }
 0x241   : > { %v877_v47 = vpop.f32.mrf.mxu2  ;;  %1178 = vmatpush.msra.mxu3 %v2650_v46 }
 0x242   : > { %2615 = vmatmul.msk.f32.gmra.mxu3 %vm653_vm1, %v877_v47 }
 0x248   : > { %2725 = vmatmul.msk.f32.gmra.mxu1 %vm653_vm1, %v1625_v25 }
 0x249   : > { %v1010_v51 = vpop.f32.mrf.mxu2 }
 0x24a   : > { %2634 = vmatmul.msk.f32.vlgmr.msrb.gmra.mxu3 %vm653_vm1, %v1010_v51 }
 0x24b   : > { %1311 = vmatpush.msrb.mxu3 %v2673_v50 }
 0x24d   : > { %1312 = vmatpush.msrb.mxu3 %v2672_v53 }
 0x24f   : > { %1313 = vmatpush.msrb.mxu3 %v2671_v56 }
 0x251   : > { %v1013_v59 = vpop.f32.mrf.mxu2  ;;  %1314 = vmatpush.msrb.mxu3 %v2670_v58  ;;  %v1706_v58 = vld [vmem:[%s4324_s7 + $0x28] sm:$0xff] }
 0x252   : > { %2635 = vmatmul.msk.f32.gmra.mxu3 %vm653_vm1, %v1013_v59  ;;  %1779 = vmatpush.msrb.mxu1 %v1706_v58  ;;  %v2771_v58 = vld [vmem:[%s4324_s7 + $0x118] sm:$0xff] }
 0x254   : > { %1780 = vmatpush.msrb.mxu1 %v1705_v60  ;;  %v2769_v60 = vld [vmem:[%s4324_s7 + $0x108] sm:$0xff] }
 0x259   : > { %v1146_v63 = vpop.f32.mrf.mxu2 }
 0x25a   : > { %2654 = vmatmul.msk.f32.vlgmr.msra.gmra.mxu3 %vm653_vm1, %v1146_v63 }
 0x25b   : > { %1447 = vmatpush.msra.mxu3 %v2693_v62  ;;  %v1704_v62 = vld [vmem:[%s4324_s7 + $0x18] sm:$0xff] }
 0x25c   : > { %1781 = vmatpush.msrb.mxu1 %v1704_v62  ;;  %v2732_v62 = vld [vmem:[%s4324_s7 + $0x48] sm:$0xff] }
 0x25d   : > { %1448 = vmatpush.msra.mxu3 %v2692_v1 }
 0x25e   : > { %1782 = vmatpush.msrb.mxu1 %v1703_v0  ;;  %v2763_v0 = vld [vmem:[%s4324_s7 + $0xf8] sm:$0xff] }
 0x25f   : > { %1449 = vmatpush.msra.mxu3 %v2691_v4  ;;  %v1701_v4 = vld [vmem:[%s4324_s7] sm:$0xff] }
 0x260   : > { %1783 = vmatpush.msrb.mxu1 %v1702_v2  ;;  %v2761_v2 = vld [vmem:[%s4324_s7 + $0xe8] sm:$0xff] }
 0x261   : > { %v1149_v7 = vpop.f32.mrf.mxu2  ;;  %1450 = vmatpush.msra.mxu3 %v2690_v6 }
 0x262   : > { %2655 = vmatmul.msk.f32.gmra.mxu3 %vm653_vm1, %v1149_v7  ;;  %1784 = vmatpush.msrb.mxu1 %v1701_v4  ;;  %v2759_v4 = vld [vmem:[%s4324_s7 + $0xd8] sm:$0xff] }
 0x269   : > { %v1282_v11 = vpop.f32.mrf.mxu2 }
 0x26a   : > { %2674 = vmatmul.msk.f32.vlgmr.msrb.gmra.mxu3 %vm653_vm1, %v1282_v11 }
 0x26b   : > { %1583 = vmatpush.msrb.mxu3 %v2713_v10 }
 0x26d   : > { %1584 = vmatpush.msrb.mxu3 %v2712_v14  ;;  %v976_v33 = vpop.f32.mrf.mxu1 }
 0x26f   : > { %1585 = vmatpush.msrb.mxu3 %v2711_v18 }
 0x271   : > { %v1285_v21 = vpop.f32.mrf.mxu2  ;;  %1586 = vmatpush.msrb.mxu3 %v2710_v20 }
 0x272   : > { %2675 = vmatmul.msk.f32.gmra.mxu3 %vm653_vm1, %v1285_v21 }
 0x275   : > { %v979_v38 = vpop.f32.mrf.mxu1 }
 0x279   : > { %v1418_v24 = vpop.f32.mrf.mxu2 }
 0x27a   : > { %2694 = vmatmul.msk.f32.vlgmr.msra.gmra.mxu3 %vm653_vm1, %v1418_v24 }
 0x27d   : > { %v1112_v43 = vpop.f32.mrf.mxu1 }
 0x281   : > { %v1421_v26 = vpop.f32.mrf.mxu2 }
 0x282   : > { %2695 = vmatmul.msk.f32.gmra.mxu3 %vm653_vm1, %v1421_v26 }
 0x285   : > { %v1115_v48 = vpop.f32.mrf.mxu1 }
 0x289   : > { %v1554_v27 = vpop.f32.mrf.mxu2 }
 0x28a   : > { %2714 = vmatmul.msk.f32.vlgmr.msrb.gmra.mxu3 %vm653_vm1, %v1554_v27 }
 0x28d   : > { %v1248_v50 = vpop.f32.mrf.mxu1 }
 0x291   : > { %v1557_v29 = vpop.f32.mrf.mxu2 }
 0x292   : > { %2715 = vmatmul.msk.f32.gmra.mxu3 %vm653_vm1, %v1557_v29 }
 0x295   : > { %v1251_v52 = vpop.f32.mrf.mxu1 }
 0x29d   : > { %v772_v31 = vpop.f32.mrf.mxu3  ;;  %v1384_v53 = vpop.f32.mrf.mxu1 }
 0x29e   : > { %v778_v35 = vadd.f32 %v772_v31, %v707_v34  ;;  %v2872_v31 = vld [vmem:[%s4322_s5] ss:$0 sm:$0xff] }
 0x2a5   : > { %v775_v32 = vpop.f32.mrf.mxu3  ;;  %v1387_v56 = vpop.f32.mrf.mxu1 }
 0x2a6   : > { %v779_v40 = vadd.f32 %v775_v32, %v710_v39 }
 0x2ad   : > { %v840_v36 = vpop.f32.mrf.mxu3  ;;  %v1520_v61 = vpop.f32.mrf.mxu1 }
 0x2ae   : > { %v846_v37 = vadd.f32 %v840_v36, %v778_v35  ;;  %v2738_v36 = vld [vmem:[%s4324_s7 + $0x78] sm:$0xff] }
 0x2af   : > { %1754 = vmatpush.msrb.mxu0 %v2738_v36  ;;  %v2809_v36 = vld [vmem:[%s4324_s7 + $0x1e8] sm:$0xff] }
 0x2b5   : > { %v843_v41 = vpop.f32.mrf.mxu3  ;;  %v1523_v9 = vpop.f32.mrf.mxu1 }
 0x2b6   : > { %v847_v42 = vadd.f32 %v843_v41, %v779_v40  ;;  %v1672_v40 = vld [vmem:[%s4323_s6] sm:$0x1]  ;;  %v2751_v41 = vld [vmem:[%s4324_s7 + $0xb8] sm:$0xff] }
 0x2bd   : > { %v908_v44 = vpop.f32.mrf.mxu3  ;;  %v1656_v20 = vpop.f32.mrf.mxu1 }
 0x2be   : > { %v914_v45 = vadd.f32 %v908_v44, %v846_v37  ;;  %v2750_v44 = vld [vmem:[%s4324_s7 + $0xb0] sm:$0xff] }
 0x2c0   : > { %v982_v46 = vadd.f32 %v976_v33, %v914_v45  ;;  %v2735_v45 = vld [vmem:[%s4324_s7 + $0x60] sm:$0xff] }
 0x2c5   : > { %v911_v47 = vpop.f32.mrf.mxu3  ;;  %v1659_v29 = vpop.f32.mrf.mxu1 }
 0x2c6   : > { %v915_v63 = vadd.f32 %v911_v47, %v847_v42  ;;  %v2728_v42 = vld [vmem:[%s4323_s6 + $0x1] sm:$0x1]  ;;  %v2734_v47 = vld [vmem:[%s4324_s7 + $0x58] sm:$0xff] }
 0x2c8   : > { %v983_v3 = vadd.f32 %v979_v38, %v915_v63  ;;  %v2737_v38 = vld [vmem:[%s4324_s7 + $0x70] sm:$0xff]  ;;  %v2731_v63 = vld [vmem:[%s4324_s7 + $0x40] sm:$0xff] }
 0x2c9   : > { %1755 = vmatpush.msrb.mxu0 %v2737_v38 }
 0x2cd   : > { %v1044_v49 = vpop.f32.mrf.mxu3 }
 0x2ce   : > { %v1050_v1 = vadd.f32 %v1044_v49, %v982_v46  ;;  %v2749_v46 = vld [vmem:[%s4324_s7 + $0xa8] sm:$0xff]  ;;  %v2741_v49 = vld [vmem:[%s4323_s6 + $0x2] sm:$0x1] }
 0x2d0   : > { %v1118_v6 = vadd.f32 %v1112_v43, %v1050_v1  ;;  %v2736_v43 = vld [vmem:[%s4324_s7 + $0x68] sm:$0xff]  ;;  %v2762_v1 = vld [vmem:[%s4324_s7 + $0xf0] sm:$0xff] }
 0x2d1   : > { %1756 = vmatpush.msrb.mxu0 %v2736_v43 }
 0x2d3   : > { %1757 = vmatpush.msrb.mxu0 %v2735_v45 }
 0x2d5   : > { %v1047_v51 = vpop.f32.mrf.mxu3  ;;  %1758 = vmatpush.msrb.mxu0 %v2734_v47  ;;  %v2807_v47 = vld [vmem:[%s4324_s7 + $0x1d8] sm:$0xff] }
 0x2d6   : > { %v1051_v7 = vadd.f32 %v1047_v51, %v983_v3  ;;  %v2747_v51 = vld [vmem:[%s4324_s7 + $0x98] sm:$0xff]  ;;  %v2760_v3 = vld [vmem:[%s4324_s7 + $0xe0] sm:$0xff] }
 0x2d8   : > { %v1119_v10 = vadd.f32 %v1115_v48, %v1051_v7  ;;  %v2748_v48 = vld [vmem:[%s4324_s7 + $0xa0] sm:$0xff] }
 0x2d9   : > { %v2756_v7 = vld [vmem:[%s4324_s7 + $0xc0] sm:$0xff] }
 0x2dd   : > { %v1180_v13 = vpop.f32.mrf.mxu3 }
 0x2de   : > { %v1186_v8 = vadd.f32 %v1180_v13, %v1118_v6  ;;  %v2746_v13 = vld [vmem:[%s4324_s7 + $0x90] sm:$0xff]  ;;  %v2757_v6 = vld [vmem:[%s4324_s7 + $0xc8] sm:$0xff] }
 0x2e0   : > { %v1254_v11 = vadd.f32 %v1248_v50, %v1186_v8  ;;  %v2733_v50 = vld [vmem:[%s4324_s7 + $0x50] sm:$0xff]  ;;  %v2787_v8 = vld [vmem:[%s4324_s7 + $0x178] sm:$0xff] }
 0x2e1   : > { %1759 = vmatpush.msrb.mxu0 %v2733_v50  ;;  %v2806_v50 = vld [vmem:[%s4324_s7 + $0x1d0] sm:$0xff] }
 0x2e3   : > { %1760 = vmatpush.msrb.mxu0 %v2732_v62 }
 0x2e5   : > { %v1183_v54 = vpop.f32.mrf.mxu3  ;;  %1761 = vmatpush.msrb.mxu0 %v2731_v63 }
 0x2e6   : > { %v1187_v12 = vadd.f32 %v1183_v54, %v1119_v10  ;;  %v2745_v54 = vld [vmem:[%s4324_s7 + $0x88] sm:$0xff]  ;;  %v2786_v10 = vld [vmem:[%s4324_s7 + $0x170] sm:$0xff] }
 0x2e7   : > { %1892 = vmatpush.msra.mxu0 %v2763_v0 }
 0x2e8   : > { %v1255_v16 = vadd.f32 %v1251_v52, %v1187_v12  ;;  %v2775_v52 = vld [vmem:[%s4324_s7 + $0x138] sm:$0xff]  ;;  %v2785_v12 = vld [vmem:[%s4324_s7 + $0x168] sm:$0xff] }
 0x2e9   : > { %1893 = vmatpush.msra.mxu0 %v2762_v1  ;;  %v2226_v1 = vld [vmem:[%s4326_s9 + $0xe0] sm:$0xff] }
 0x2eb   : > { %1894 = vmatpush.msra.mxu0 %v2761_v2  ;;  %v2227_v2 = vld [vmem:[%s4326_s9 + $0xe8] sm:$0xff] }
 0x2ed   : > { %v1316_v55 = vpop.f32.mrf.mxu3  ;;  %1895 = vmatpush.msra.mxu0 %v2760_v3  ;;  %v2228_v3 = vld [vmem:[%s4326_s9 + $0xf0] sm:$0xff] }
 0x2ee   : > { %v1322_v15 = vadd.f32 %v1316_v55, %v1254_v11  ;;  %v2773_v55 = vld [vmem:[%s4324_s7 + $0x128] sm:$0xff] }
 0x2ef   : > { %1896 = vmatpush.msra.mxu0 %v2759_v4  ;;  %v2229_v4 = vld [vmem:[%s4326_s9 + $0xf8] sm:$0xff] }
 0x2f0   : > { %v1390_v18 = vadd.f32 %v1384_v53, %v1322_v15  ;;  %v2774_v53 = vld [vmem:[%s4324_s7 + $0x130] sm:$0xff]  ;;  %v2765_v15 = vld [vmem:[%s4323_s6 + $0x4] sm:$0x1] }
 0x2f5   : > { %v1319_v59 = vpop.f32.mrf.mxu3 }
 0x2f6   : > { %v1323_v19 = vadd.f32 %v1319_v59, %v1255_v16  ;;  %v2770_v59 = vld [vmem:[%s4324_s7 + $0x110] sm:$0xff]  ;;  %v2783_v16 = vld [vmem:[%s4324_s7 + $0x158] sm:$0xff] }
 0x2f8   : > { %v1391_v23 = vadd.f32 %v1387_v56, %v1323_v19  ;;  %v2744_v56 = vld [vmem:[%s4324_s7 + $0x80] sm:$0xff]  ;;  %v2782_v19 = vld [vmem:[%s4324_s7 + $0x150] sm:$0xff] }
 0x2fd   : > { %v1452_v5 = vpop.f32.mrf.mxu3 }
 0x2fe   : > { %v1458_v21 = vadd.f32 %v1452_v5, %v1390_v18  ;;  %v2758_v5 = vld [vmem:[%s4324_s7 + $0xd0] sm:$0xff] }
 0x2ff   : > { %1897 = vmatpush.msra.mxu0 %v2758_v5  ;;  %v2222_v5 = vld [vmem:[%s4326_s9 + $0xc0] sm:$0xff] }
 0x300   : > { %v1526_v24 = vadd.f32 %v1520_v61, %v1458_v21  ;;  %v2768_v61 = vld [vmem:[%s4324_s7 + $0x100] sm:$0xff] }
 0x301   : > { %1898 = vmatpush.msra.mxu0 %v2757_v6  ;;  %v2780_v21 = vld [vmem:[%s4324_s7 + $0x140] sm:$0xff]  ;;  %v2223_v6 = vld [vmem:[%s4326_s9 + $0xc8] sm:$0xff] }
 0x303   : > { %1899 = vmatpush.msra.mxu0 %v2756_v7  ;;  %v2224_v7 = vld [vmem:[%s4326_s9 + $0xd0] sm:$0xff] }
 0x305   : > { %v1455_v14 = vpop.f32.mrf.mxu3 }
 0x306   : > { %v1459_v25 = vadd.f32 %v1455_v14, %v1391_v23  ;;  %v2784_v14 = vld [vmem:[%s4324_s7 + $0x160] sm:$0xff] }
 0x308   : > { %v1527_v27 = vadd.f32 %v1523_v9, %v1459_v25  ;;  %v2799_v25 = vld [vmem:[%s4324_s7 + $0x1b8] sm:$0xff] }
 0x30d   : > { %v1588_v22 = vpop.f32.mrf.mxu3 }
 0x30e   : > { %v1594_v26 = vadd.f32 %v1588_v22, %v1526_v24  ;;  %v2777_v22 = vld [vmem:[%s4323_s6 + $0x5] sm:$0x1]  ;;  %v2789_v24 = vld [vmem:[%s4323_s6 + $0x6] sm:$0x1] }
 0x310   : > { %v1662_v30 = vadd.f32 %v1656_v20, %v1594_v26  ;;  %v2781_v20 = vld [vmem:[%s4324_s7 + $0x148] sm:$0xff]  ;;  %v2798_v26 = vld [vmem:[%s4324_s7 + $0x1b0] sm:$0xff] }
 0x312   : > { %v1668_v34 = vadd.f32 %v2872_v31, %v1662_v30  ;;  %v2794_v30 = vld [vmem:[%s4324_s7 + $0x190] sm:$0xff] }
 0x314   : > { %v3718_v39 = vmax.f32 %v1668_v34, 0.0  ;;  %v2810_v34 = vld [vmem:[%s4324_s7 + $0x1f0] sm:$0xff] }
 0x315   : > { %v1591_v28 = vpop.f32.mrf.mxu3 }
 0x316   : > { %v1595_v32 = vadd.f32 %v1591_v28, %v1527_v27  ;;  %v2797_v27 = vld [vmem:[%s4324_s7 + $0x1a8] sm:$0xff]  ;;  %v2796_v28 = vld [vmem:[%s4324_s7 + $0x1a0] sm:$0xff] }
 0x318   : > { %v1663_v33 = vadd.f32 %v1659_v29, %v1595_v32  ;;  %v2795_v29 = vld [vmem:[%s4324_s7 + $0x198] sm:$0xff]  ;;  %v2792_v32 = vld [vmem:[%s4324_s7 + $0x180] sm:$0xff] }
 0x31a   : > { %v1669_v35 = vadd.f32 %v2872_v31, %v1663_v33  ;;  %v2793_v31 = vld [vmem:[%s4324_s7 + $0x188] sm:$0xff]  ;;  %v2811_v33 = vld [vmem:[%s4324_s7 + $0x1f8] sm:$0xff] }
 0x31c   : > { %v3713_v37 = vmax.f32 %v1669_v35, 0.0 }
 0x31e   : > { %2726 = vmatpush.msk.msra.mxu2 %vm1677_vm2, %v3713_v37  ;;  %2729 = vmatpush.msk.msra.mxu3 %vm1677_vm2, %v3713_v37 }
 0x31f   : > { %2766 = vmatpush.msk.msra.mxu1 %vm1677_vm2, %v3713_v37 }
 0x320   : > { %1696 = vmatpush.msra.mxu2 %v3718_v39  ;;  %1729 = vmatpush.msra.mxu3 %v3718_v39 }
 0x321   : > { %1925 = vmatpush.msra.mxu1 %v3718_v39  ;;  %2727 = vmatmul.msk.f32.vlgmr.msra.gmra.mxu2 %vm1673_vm3, %v1672_v40 }
 0x322   : > { %2742 = vmatpush.msk.msrb.mxu2 %vm1677_vm2, %v3713_v37  ;;  %1834 = vmatpush.msrb.mxu3 %v2751_v41  ;;  %v2801_v41 = vld [vmem:[%s4323_s6 + $0x7] sm:$0x1] }
 0x323   : > { %2730 = vmatmul.msk.f32.vlgmr.msra.gmra.mxu3 %vm1673_vm3, %v2728_v42 }
 0x324   : > { %1809 = vmatpush.msrb.mxu2 %v3718_v39  ;;  %1835 = vmatpush.msrb.mxu3 %v2750_v44  ;;  %v2813_v44 = vld [vmem:[%s4323_s6 + $0x8] sm:$0x1] }
 0x326   : > { %2754 = vmatpush.msk.msra.mxu2 %vm1677_vm2, %v3713_v37  ;;  %1836 = vmatpush.msrb.mxu3 %v2749_v46  ;;  %v2808_v46 = vld [vmem:[%s4324_s7 + $0x1e0] sm:$0xff] }
 0x328   : > { %1867 = vmatpush.msra.mxu2 %v3718_v39  ;;  %1837 = vmatpush.msrb.mxu3 %v2748_v48  ;;  %v2823_v48 = vld [vmem:[%s4324_s7 + $0x238] sm:$0xff] }
 0x329   : > { %2743 = vmatmul.msk.f32.vlgmr.msrb.gmra.mxu2 %vm1673_vm3, %v2741_v49  ;;  %v2822_v49 = vld [vmem:[%s4324_s7 + $0x230] sm:$0xff] }
 0x32a   : > { %1838 = vmatpush.msrb.mxu3 %v2747_v51  ;;  %1950 = vmatpush.msrb.mxu2 %v2775_v52  ;;  %v2821_v51 = vld [vmem:[%s4324_s7 + $0x228] sm:$0xff] }
 0x32b   : > { %v2805_v52 = vld [vmem:[%s4324_s7 + $0x1c8] sm:$0xff] }
 0x32c   : > { %1839 = vmatpush.msrb.mxu3 %v2746_v13  ;;  %1951 = vmatpush.msrb.mxu2 %v2774_v53  ;;  %v2804_v13 = vld [vmem:[%s4324_s7 + $0x1c0] sm:$0xff] }
 0x32d   : > { %v2820_v53 = vld [vmem:[%s4324_s7 + $0x220] sm:$0xff] }
 0x32e   : > { %1840 = vmatpush.msrb.mxu3 %v2745_v54  ;;  %1952 = vmatpush.msrb.mxu2 %v2773_v55  ;;  %v2819_v54 = vld [vmem:[%s4324_s7 + $0x218] sm:$0xff]  ;;  %v2818_v55 = vld [vmem:[%s4324_s7 + $0x210] sm:$0xff] }
 0x330   : > { %1841 = vmatpush.msrb.mxu3 %v2744_v56  ;;  %1953 = vmatpush.msrb.mxu2 %v2772_v17  ;;  %v2817_v56 = vld [vmem:[%s4324_s7 + $0x208] sm:$0xff]  ;;  %v2816_v17 = vld [vmem:[%s4324_s7 + $0x200] sm:$0xff] }
 0x331   : > { %2755 = vmatmul.msk.f32.vlgmr.msra.gmra.mxu2 %vm1673_vm3, %v2753_v57 }
 0x332   : > { %2778 = vmatpush.msk.msra.mxu3 %vm1677_vm2, %v3713_v37  ;;  %1954 = vmatpush.msrb.mxu2 %v2771_v58 }
 0x334   : > { %1983 = vmatpush.msra.mxu3 %v3718_v39  ;;  %1955 = vmatpush.msrb.mxu2 %v2770_v59 }
 0x336   : > { %1956 = vmatpush.msrb.mxu2 %v2769_v60 }
 0x338   : > { %1957 = vmatpush.msrb.mxu2 %v2768_v61 }
 0x33a   : > { %2802 = vmatpush.msk.msra.mxu2 %vm1677_vm2, %v3713_v37 }
 0x33c   : > { %2099 = vmatpush.msra.mxu2 %v3718_v39 }
 0x3a4   : > { %v1698_v9 = vpop.f32.mrf.mxu2 }
 0x3a5   : > { %2740 = vmatmul.msk.f32.vlgmr.msrb.gmra.mxu1 %vm582_vm0, %v1698_v9  ;;  %v2218_v9 = vld [vmem:[%s4326_s9 + $0xa0] sm:$0xff] }
 0x3a6   : > { %2008 = vmatpush.msrb.mxu1 %v2787_v8  ;;  %v1731_v11 = vpop.f32.mrf.mxu3  ;;  %v2225_v8 = vld [vmem:[%s4326_s9 + $0xd8] sm:$0xff] }
 0x3a7   : > { %2739 = vmatmul.msk.f32.vlgmr.msrb.gmra.mxu0 %vm582_vm0, %v1731_v11  ;;  %v2220_v11 = vld [vmem:[%s4326_s9 + $0xb0] sm:$0xff] }
 0x3a8   : > { %2009 = vmatpush.msrb.mxu1 %v2786_v10  ;;  %2066 = vmatpush.msrb.mxu0 %v2799_v25  ;;  %v2219_v10 = vld [vmem:[%s4326_s9 + $0xa8] sm:$0xff]  ;;  %v2208_v25 = vld [vmem:[%s4326_s9 + $0x50] sm:$0xff] }
 0x3aa   : > { %2010 = vmatpush.msrb.mxu1 %v2785_v12  ;;  %2067 = vmatpush.msrb.mxu0 %v2798_v26  ;;  %v2221_v12 = vld [vmem:[%s4326_s9 + $0xb8] sm:$0xff] }
 0x3ab   : > { %v2209_v26 = vld [vmem:[%s4326_s9 + $0x58] sm:$0xff] }
 0x3ac   : > { %2011 = vmatpush.msrb.mxu1 %v2784_v14  ;;  %v1811_v18 = vpop.f32.mrf.mxu2  ;;  %2068 = vmatpush.msrb.mxu0 %v2797_v27  ;;  %v2214_v14 = vld [vmem:[%s4326_s9 + $0x80] sm:$0xff] }
 0x3ad   : > { %2752 = vmatmul.msk.f32.vlgmr.msrb.gmra.mxu3 %vm582_vm0, %v1811_v18  ;;  %2767 = vmatmul.msk.f32.vlgmr.msra.gmra.mxu1 %vm1673_vm3, %v2765_v15  ;;  %v2215_v15 = vld [vmem:[%s4326_s9 + $0x88] sm:$0xff]  ;;  %v2217_v18 = vld [vmem:[%s4326_s9 + $0x98] sm:$0xff]  ;;  %v2202_v27 = vld [vmem:[%s4326_s9 + $0x20] sm:$0xff] }
 0x3ae   : > { %2012 = vmatpush.msrb.mxu1 %v2783_v16  ;;  %2790 = vmatpush.msk.msrb.mxu3 %vm1677_vm2, %v3713_v37  ;;  %v2216_v16 = vld [vmem:[%s4326_s9 + $0x90] sm:$0xff] }
 0x3af   : > { %2069 = vmatpush.msrb.mxu0 %v2796_v28  ;;  %v2203_v28 = vld [vmem:[%s4326_s9 + $0x28] sm:$0xff] }
 0x3b0   : > { %2013 = vmatpush.msrb.mxu1 %v2782_v19  ;;  %2041 = vmatpush.msrb.mxu3 %v3718_v39  ;;  %v2210_v19 = vld [vmem:[%s4326_s9 + $0x60] sm:$0xff] }
 0x3b1   : > { %2070 = vmatpush.msrb.mxu0 %v2795_v29  ;;  %v2204_v29 = vld [vmem:[%s4326_s9 + $0x30] sm:$0xff] }
 0x3b2   : > { %2014 = vmatpush.msrb.mxu1 %v2781_v20  ;;  %v2211_v20 = vld [vmem:[%s4326_s9 + $0x68] sm:$0xff] }
 0x3b3   : > { %2071 = vmatpush.msrb.mxu0 %v2794_v30  ;;  %v2205_v30 = vld [vmem:[%s4326_s9 + $0x38] sm:$0xff] }
 0x3b4   : > { %2015 = vmatpush.msrb.mxu1 %v2780_v21  ;;  %v1869_v23 = vpop.f32.mrf.mxu2  ;;  %v2212_v21 = vld [vmem:[%s4326_s9 + $0x70] sm:$0xff] }
 0x3b5   : > { %2779 = vmatmul.msk.f32.vlgmr.msra.gmra.mxu3 %vm1673_vm3, %v2777_v22  ;;  %2764 = vmatmul.msk.f32.vlgmr.msra.gmra.mxu0 %vm582_vm0, %v1869_v23  ;;  %v2213_v22 = vld [vmem:[%s4326_s9 + $0x78] sm:$0xff]  ;;  %v2206_v23 = vld [vmem:[%s4326_s9 + $0x40] sm:$0xff] }
 0x3b6   : > { %2814 = vmatpush.msk.msra.mxu1 %vm1677_vm2, %v3713_v37  ;;  %2072 = vmatpush.msrb.mxu0 %v2793_v31  ;;  %v2198_v31 = vld [vmem:[%s4326_s9] sm:$0xff] }
 0x3b7   : > { %2124 = vmatpush.msra.mxu3 %v2811_v33  ;;  %v2200_v33 = vld [vmem:[%s4326_s9 + $0x10] sm:$0xff] }
 0x3b8   : > { %2157 = vmatpush.msra.mxu1 %v3718_v39  ;;  %2073 = vmatpush.msrb.mxu0 %v2792_v32  ;;  %v2199_v32 = vld [vmem:[%s4326_s9 + $0x8] sm:$0xff] }
 0x3b9   : > { %2125 = vmatpush.msra.mxu3 %v2810_v34  ;;  %v2201_v34 = vld [vmem:[%s4326_s9 + $0x18] sm:$0xff] }
 0x3ba   : > { %2251 = vmatpush.msra.mxu0 %v2226_v1  ;;  %v2334_v1 = vld [vmem:[%s4328_s11 + $0x38] sm:$0xff] }
 0x3bb   : > { %2126 = vmatpush.msra.mxu3 %v2809_v36  ;;  %v2358_v36 = vld [vmem:[%s4328_s11 + $0xf8] sm:$0xff] }
 0x3bc   : > { %2252 = vmatpush.msra.mxu0 %v2222_v5  ;;  %v2333_v5 = vld [vmem:[%s4328_s11 + $0x30] sm:$0xff] }
 0x3bd   : > { %2791 = vmatmul.msk.f32.vlgmr.msrb.gmra.mxu3 %vm1673_vm3, %v2789_v24  ;;  %v2207_v24 = vld [vmem:[%s4326_s9 + $0x48] sm:$0xff] }
 0x3be   : > { %2127 = vmatpush.msra.mxu3 %v2808_v46  ;;  %2253 = vmatpush.msra.mxu0 %v2218_v9  ;;  %v2355_v46 = vld [vmem:[%s4328_s11 + $0xe0] sm:$0xff]  ;;  %v2365_v9 = vld [vmem:[%s4328_s11 + $0x130] sm:$0xff] }
 0x3c0   : > { %2128 = vmatpush.msra.mxu3 %v2807_v47  ;;  %2254 = vmatpush.msra.mxu0 %v2214_v14  ;;  %v2372_v47 = vld [vmem:[%s4328_s11 + $0x168] sm:$0xff]  ;;  %v2381_v14 = vld [vmem:[%s4328_s11 + $0x1b0] sm:$0xff] }
 0x3c2   : > { %2129 = vmatpush.msra.mxu3 %v2806_v50  ;;  %2255 = vmatpush.msra.mxu0 %v2210_v19  ;;  %v2338_v50 = vld [vmem:[%s4328_s11 + $0x58] sm:$0xff] }
 0x3c4   : > { %2130 = vmatpush.msra.mxu3 %v2805_v52  ;;  %2256 = vmatpush.msra.mxu0 %v2206_v23  ;;  %v2387_v52 = vld [vmem:[%s4328_s11 + $0x1e0] sm:$0xff] }
 0x3c6   : > { %2131 = vmatpush.msra.mxu3 %v2804_v13  ;;  %2257 = vmatpush.msra.mxu0 %v2202_v27  ;;  %v2370_v13 = vld [vmem:[%s4328_s11 + $0x158] sm:$0xff]  ;;  %v2345_v27 = vld [vmem:[%s4328_s11 + $0x90] sm:$0xff] }
 0x3c8   : > { %2291 = vmatpush.msrb.mxu3 %v2228_v3  ;;  %2258 = vmatpush.msra.mxu0 %v2198_v31  ;;  %v2383_v3 = vld [vmem:[%s4328_s11 + $0x1c0] sm:$0xff]  ;;  %v2344_v31 = vld [vmem:[%s4328_s11 + $0x88] sm:$0xff] }
 0x3ca   : > { %2292 = vmatpush.msrb.mxu3 %v2224_v7 }
 0x3cc   : > { %2293 = vmatpush.msrb.mxu3 %v2220_v11  ;;  %v2348_v11 = vld [vmem:[%s4328_s11 + $0xa8] sm:$0xff] }
 0x3ce   : > { %2294 = vmatpush.msrb.mxu3 %v2216_v16  ;;  %v2331_v16 = vld [vmem:[%s4328_s11 + $0x20] sm:$0xff] }
 0x3d0   : > { %2295 = vmatpush.msrb.mxu3 %v2212_v21 }
 0x3d2   : > { %2296 = vmatpush.msrb.mxu3 %v2208_v25 }
 0x3d4   : > { %2297 = vmatpush.msrb.mxu3 %v2204_v29  ;;  %v2380_v29 = vld [vmem:[%s4328_s11 + $0x1a8] sm:$0xff] }
 0x3d6   : > { %2298 = vmatpush.msrb.mxu3 %v2200_v33  ;;  %v2379_v33 = vld [vmem:[%s4328_s11 + $0x1a0] sm:$0xff] }
 0x422   : > { %v1786_v35 = vpop.f32.mrf.mxu1 }
 0x424   : > { %v1763_v38 = vpop.f32.mrf.mxu0 }
 0x425   : > { %v1787_v39 = vadd.f32 %v1786_v35, %v1763_v38  ;;  %v2342_v35 = vld [vmem:[%s4328_s11 + $0x78] sm:$0xff]  ;;  %v2357_v38 = vld [vmem:[%s4328_s11 + $0xf0] sm:$0xff] }
 0x42a   : > { %v1927_v37 = vpop.f32.mrf.mxu1 }
 0x42b   : > { %2776 = vmatmul.msk.f32.vlgmr.msrb.gmra.mxu2 %vm582_vm0, %v1927_v37  ;;  %v2341_v37 = vld [vmem:[%s4328_s11 + $0x70] sm:$0xff] }
 0x42c   : > { %2182 = vmatpush.msrb.mxu2 %v2823_v48  ;;  %v2388_v48 = vld [vmem:[%s4328_s11 + $0x1e8] sm:$0xff] }
 0x42e   : > { %2183 = vmatpush.msrb.mxu2 %v2822_v49  ;;  %v2371_v49 = vld [vmem:[%s4328_s11 + $0x160] sm:$0xff] }
 0x430   : > { %v1843_v40 = vpop.f32.mrf.mxu3  ;;  %2184 = vmatpush.msrb.mxu2 %v2821_v51  ;;  %v2354_v51 = vld [vmem:[%s4328_s11 + $0xd8] sm:$0xff] }
 0x431   : > { %v1846_v42 = vadd.f32 %v1843_v40, %v1787_v39  ;;  %v2374_v39 = vld [vmem:[%s4328_s11 + $0x178] sm:$0xff]  ;;  %v2340_v40 = vld [vmem:[%s4328_s11 + $0x68] sm:$0xff] }
 0x432   : > { %2185 = vmatpush.msrb.mxu2 %v2820_v53  ;;  %v1901_v57 = vpop.f32.mrf.mxu0  ;;  %v2337_v53 = vld [vmem:[%s4328_s11 + $0x50] sm:$0xff] }
 0x433   : > { %2803 = vmatmul.msk.f32.vlgmr.msra.gmra.mxu2 %vm1673_vm3, %v2801_v41  ;;  %v1904_v58 = vadd.f32 %v1901_v57, %v1846_v42  ;;  %v2356_v41 = vld [vmem:[%s4328_s11 + $0xe8] sm:$0xff]  ;;  %v2390_v42 = vld [vmem:[%s4328_s11 + $0x1f8] sm:$0xff] }
 0x434   : > { %2186 = vmatpush.msrb.mxu2 %v2819_v54  ;;  %v2353_v54 = vld [vmem:[%s4328_s11 + $0xd0] sm:$0xff]  ;;  %v2352_v57 = vld [vmem:[%s4328_s11 + $0xc8] sm:$0xff] }
 0x436   : > { %2187 = vmatpush.msrb.mxu2 %v2818_v55  ;;  %v2386_v55 = vld [vmem:[%s4328_s11 + $0x1d8] sm:$0xff] }
 0x438   : > { %v1985_v43 = vpop.f32.mrf.mxu3  ;;  %2188 = vmatpush.msrb.mxu2 %v2817_v56  ;;  %v2369_v56 = vld [vmem:[%s4328_s11 + $0x150] sm:$0xff] }
 0x439   : > { %2788 = vmatmul.msk.f32.vlgmr.msrb.gmra.mxu1 %vm582_vm0, %v1985_v43  ;;  %v2373_v43 = vld [vmem:[%s4328_s11 + $0x170] sm:$0xff] }
 0x43a   : > { %2189 = vmatpush.msrb.mxu2 %v2816_v17  ;;  %2271 = vmatpush.msrb.mxu1 %v2227_v2  ;;  %v2336_v17 = vld [vmem:[%s4328_s11 + $0x48] sm:$0xff]  ;;  %v2350_v2 = vld [vmem:[%s4328_s11 + $0xb8] sm:$0xff] }
 0x43c   : > { %2311 = vmatpush.msra.mxu2 %v2229_v4  ;;  %2272 = vmatpush.msrb.mxu1 %v2223_v6  ;;  %v2366_v4 = vld [vmem:[%s4328_s11 + $0x138] sm:$0xff]  ;;  %v2349_v6 = vld [vmem:[%s4328_s11 + $0xb0] sm:$0xff] }
 0x43e   : > { %2312 = vmatpush.msra.mxu2 %v2225_v8  ;;  %2273 = vmatpush.msrb.mxu1 %v2219_v10  ;;  %v2382_v8 = vld [vmem:[%s4328_s11 + $0x1b8] sm:$0xff]  ;;  %v2332_v10 = vld [vmem:[%s4328_s11 + $0x28] sm:$0xff] }
 0x440   : > { %v2043_v45 = vpop.f32.mrf.mxu3  ;;  %2313 = vmatpush.msra.mxu2 %v2221_v12  ;;  %2274 = vmatpush.msrb.mxu1 %v2215_v15 }
 0x441   : > { %2800 = vmatmul.msk.f32.vlgmr.msrb.gmra.mxu0 %vm582_vm0, %v2043_v45  ;;  %2815 = vmatmul.msk.f32.vlgmr.msra.gmra.mxu1 %vm1673_vm3, %v2813_v44  ;;  %v2389_v44 = vld [vmem:[%s4328_s11 + $0x1f0] sm:$0xff]  ;;  %v2339_v45 = vld [vmem:[%s4328_s11 + $0x60] sm:$0xff] }
 0x442   : > { %2314 = vmatpush.msra.mxu2 %v2217_v18  ;;  %2275 = vmatpush.msrb.mxu1 %v2211_v20  ;;  %v2347_v18 = vld [vmem:[%s4328_s11 + $0xa0] sm:$0xff]  ;;  %v2330_v20 = vld [vmem:[%s4328_s11 + $0x18] sm:$0xff] }
 0x443   : > { %2392 = vmatpush.msrb.mxu0 %v2342_v35  ;;  %v2343_v35 = vld [vmem:[%s4328_s11 + $0x80] sm:$0xff] }
 0x444   : > { %2315 = vmatpush.msra.mxu2 %v2213_v22  ;;  %2276 = vmatpush.msrb.mxu1 %v2207_v24  ;;  %v2195_v22 = vld [vmem:[%s4325_s8] sm:$0x1] }
 0x445   : > { %2393 = vmatpush.msrb.mxu0 %v2341_v37  ;;  %v2378_v37 = vld [vmem:[%s4328_s11 + $0x198] sm:$0xff] }
 0x446   : > { %2316 = vmatpush.msra.mxu2 %v2209_v26  ;;  %2277 = vmatpush.msrb.mxu1 %v2203_v28  ;;  %v2329_v26 = vld [vmem:[%s4328_s11 + $0x10] sm:$0xff]  ;;  %v2364_v28 = vld [vmem:[%s4328_s11 + $0x128] sm:$0xff] }
 0x447   : > { %2394 = vmatpush.msrb.mxu0 %v2340_v40  ;;  %v2360_v40 = vld [vmem:[%s4328_s11 + $0x108] sm:$0xff] }
 0x448   : > { %2317 = vmatpush.msra.mxu2 %v2205_v30  ;;  %2278 = vmatpush.msrb.mxu1 %v2199_v32  ;;  %v2328_v30 = vld [vmem:[%s4328_s11 + $0x8] sm:$0xff]  ;;  %v2363_v32 = vld [vmem:[%s4328_s11 + $0x120] sm:$0xff] }
 0x449   : > { %2395 = vmatpush.msrb.mxu0 %v2339_v45 }
 0x44a   : > { %2318 = vmatpush.msra.mxu2 %v2201_v34  ;;  %2412 = vmatpush.msra.mxu1 %v2358_v36  ;;  %v2327_v34 = vld [vmem:[%s4328_s11] sm:$0xff]  ;;  %v2362_v36 = vld [vmem:[%s4328_s11 + $0x118] sm:$0xff] }
 0x44b   : > { %2396 = vmatpush.msrb.mxu0 %v2338_v50 }
 0x44c   : > { %2413 = vmatpush.msra.mxu1 %v2357_v38  ;;  %v2361_v38 = vld [vmem:[%s4328_s11 + $0x110] sm:$0xff] }
 0x44d   : > { %2397 = vmatpush.msrb.mxu0 %v2337_v53 }
 0x44e   : > { %2414 = vmatpush.msra.mxu1 %v2356_v41  ;;  %v2376_v41 = vld [vmem:[%s4328_s11 + $0x188] sm:$0xff] }
 0x44f   : > { %2398 = vmatpush.msrb.mxu0 %v2336_v17 }
 0x450   : > { %2415 = vmatpush.msra.mxu1 %v2355_v46 }
 0x452   : > { %2416 = vmatpush.msra.mxu1 %v2354_v51 }
 0x454   : > { %2417 = vmatpush.msra.mxu1 %v2353_v54 }
 0x456   : > { %2418 = vmatpush.msra.mxu1 %v2352_v57 }
 0x4ae   : > { %v1959_v59 = vpop.f32.mrf.mxu2 }
 0x4af   : > { %v1962_v60 = vadd.f32 %v1959_v59, %v1904_v58  ;;  %v2385_v58 = vld [vmem:[%s4328_s11 + $0x1d0] sm:$0xff]  ;;  %v2368_v59 = vld [vmem:[%s4328_s11 + $0x148] sm:$0xff] }
 0x4b6   : > { %v2017_v61 = vpop.f32.mrf.mxu1  ;;  %v2101_v62 = vpop.f32.mrf.mxu2 }
 0x4b7   : > { %v3976_v63 = vadd.f32 %v2017_v61, %v1962_v60  ;;  %2812 = vmatmul.msk.f32.vlgmr.msra.gmra.mxu3 %vm582_vm0, %v2101_v62  ;;  %v2335_v60 = vld [vmem:[%s4328_s11 + $0x40] sm:$0xff]  ;;  %v2384_v62 = vld [vmem:[%s4328_s11 + $0x1c8] sm:$0xff] }
 0x4b8   : > { %2432 = vmatpush.msra.mxu3 %v2374_v39  ;;  %v2351_v61 = vld [vmem:[%s4328_s11 + $0xc0] sm:$0xff]  ;;  %2399 = vmatpush.msrb.mxu0 %v2335_v60  ;;  %v2377_v39 = vld [vmem:[%s4328_s11 + $0x190] sm:$0xff] }
 0x4b9   : > { %2419 = vmatpush.msra.mxu1 %v2351_v61 }
 0x4ba   : > { %2433 = vmatpush.msra.mxu3 %v2373_v43  ;;  %2400 = vmatpush.msrb.mxu0 %v2334_v1  ;;  %v2375_v43 = vld [vmem:[%s4328_s11 + $0x180] sm:$0xff] }
 0x4bb   : > { %2420 = vmatpush.msra.mxu1 %v2350_v2 }
 0x4bc   : > { %2434 = vmatpush.msra.mxu3 %v2372_v47  ;;  %2401 = vmatpush.msrb.mxu0 %v2333_v5 }
 0x4bd   : > { %2421 = vmatpush.msra.mxu1 %v2349_v6 }
 0x4be   : > { %v2159_v0 = vpop.f32.mrf.mxu1  ;;  %2435 = vmatpush.msra.mxu3 %v2371_v49  ;;  %v2075_v7 = vpop.f32.mrf.mxu0  ;;  %2402 = vmatpush.msrb.mxu0 %v2332_v10 }
 0x4bf   : > { %2824 = vmatmul.msk.f32.vlgmr.msrb.gmra.mxu2 %vm582_vm0, %v2159_v0  ;;  %v2367_v0 = vld [vmem:[%s4328_s11 + $0x140] sm:$0xff]  ;;  %v2078_v15 = vadd.f32 %v2075_v7, %v3976_v63  ;;  %2422 = vmatpush.msra.mxu1 %v2348_v11  ;;  %v2346_v63 = vld [vmem:[%s4328_s11 + $0x98] sm:$0xff] }
 0x4c0   : > { %2452 = vmatpush.msrb.mxu2 %v2390_v42  ;;  %2436 = vmatpush.msra.mxu3 %v2370_v13  ;;  %v2359_v42 = vld [vmem:[%s4328_s11 + $0x100] sm:$0xff] }
 0x4c1   : > { %2403 = vmatpush.msrb.mxu0 %v2331_v16  ;;  %2423 = vmatpush.msra.mxu1 %v2347_v18 }
 0x4c2   : > { %2453 = vmatpush.msrb.mxu2 %v2389_v44  ;;  %2437 = vmatpush.msra.mxu3 %v2369_v56  ;;  %v2230_v44 = vld [vmem:[%s4327_s10] sm:$0xf] }
 0x4c3   : > { %2404 = vmatpush.msrb.mxu0 %v2330_v20  ;;  %2424 = vmatpush.msra.mxu1 %v2346_v63  ;;  %v2232_v45 = vperm.slane %v2230_v44, 0  ;;  %v2233_v46 = vperm.slane %v2230_v44, 1  ;;  %v2234_v13 = vperm.slane %v2230_v44, 2  ;;  %v2235_v53 = vperm.slane %v2230_v44, 3 }
 0x4c4   : > { %2454 = vmatpush.msrb.mxu2 %v2388_v48  ;;  %2438 = vmatpush.msra.mxu3 %v2368_v59  ;;  %v2391_v59 = vld [vmem:[%s4329_s12] sm:$0x1] }
 0x4c5   : > { %2405 = vmatpush.msrb.mxu0 %v2329_v26  ;;  %2425 = vmatpush.msra.mxu1 %v2345_v27 }
 0x4c6   : > { %2455 = vmatpush.msrb.mxu2 %v2387_v52  ;;  %2439 = vmatpush.msra.mxu3 %v2367_v0 }
 0x4c7   : > { %2406 = vmatpush.msrb.mxu0 %v2328_v30  ;;  %2426 = vmatpush.msra.mxu1 %v2344_v31 }
 0x4c8   : > { %2456 = vmatpush.msrb.mxu2 %v2386_v55  ;;  %2440 = vmatpush.msra.mxu3 %v2366_v4 }
 0x4c9   : > { %2407 = vmatpush.msrb.mxu0 %v2327_v34  ;;  %2427 = vmatpush.msra.mxu1 %v2343_v35 }
 0x4ca   : > { %2457 = vmatpush.msrb.mxu2 %v2385_v58  ;;  %2441 = vmatpush.msra.mxu3 %v2365_v9 }
 0x4cc   : > { %2458 = vmatpush.msrb.mxu2 %v2384_v62  ;;  %2442 = vmatpush.msra.mxu3 %v2364_v28 }
 0x4ce   : > { %2459 = vmatpush.msrb.mxu2 %v2383_v3  ;;  %2443 = vmatpush.msra.mxu3 %v2363_v32 }
 0x4d0   : > { %2460 = vmatpush.msrb.mxu2 %v2382_v8  ;;  %2444 = vmatpush.msra.mxu3 %v2362_v36 }
 0x4d2   : > { %2461 = vmatpush.msrb.mxu2 %v2381_v14  ;;  %2445 = vmatpush.msra.mxu3 %v2361_v38 }
 0x4d4   : > { %2462 = vmatpush.msrb.mxu2 %v2380_v29  ;;  %2446 = vmatpush.msra.mxu3 %v2360_v40 }
 0x4d6   : > { %2463 = vmatpush.msrb.mxu2 %v2379_v33  ;;  %2447 = vmatpush.msra.mxu3 %v2359_v42 }
 0x4d8   : > { %2464 = vmatpush.msrb.mxu2 %v2378_v37 }
 0x4da   : > { %2465 = vmatpush.msrb.mxu2 %v2377_v39 }
 0x4dc   : > { %2466 = vmatpush.msrb.mxu2 %v2376_v41 }
 0x4de   : > { %2467 = vmatpush.msrb.mxu2 %v2375_v43 }
 0x53a   : > { %v2133_v12 = vpop.f32.mrf.mxu3 }
 0x53b   : > { %v2136_v19 = vadd.f32 %v2133_v12, %v2078_v15 }
 0x542   : > { %v2191_v21 = vpop.f32.mrf.mxu2 }
 0x543   : > { %v2194_v23 = vadd.f32 %v2191_v21, %v2136_v19 }
 0x545   : > { %v2196_v24 = vadd.f32 %v2195_v22, %v2194_v23 }
 0x547   : > { %v2197_v25 = vmax.f32 %v2196_v24, 0.0 }
 0x549   : > { %2825 = vmatmul.msk.f32.vlgmr.msra.gmra.mxu0 %vm582_vm0, %v2197_v25  ;;  %2826 = vmatmul.msk.f32.vlgmr.msrb.gmra.mxu1 %vm582_vm0, %v2197_v25 }
 0x54a   : > { %2827 = vmatmul.msk.f32.vlgmr.msrb.gmra.mxu3 %vm582_vm0, %v2197_v25  ;;  %2828 = vmatmul.msk.f32.vlgmr.msra.gmra.mxu2 %vm582_vm0, %v2197_v25 }
 0x5c6   : > { %v2260_v47 = vpop.f32.mrf.mxu0  ;;  %v2280_v48 = vpop.f32.mrf.mxu1 }
 0x5c7   : > { %v2261_v49 = vadd.f32 %v2260_v47, %v2232_v45  ;;  %v2281_v50 = vadd.f32 %v2280_v48, %v2233_v46 }
 0x5c9   : > { %v2323_v51 = vmax.f32 %v2261_v49, 0.0  ;;  %v2324_v52 = vmax.f32 %v2281_v50, 0.0 }
 0x5cb   : > { %2408 = vmatmul.f32.vlgmr.msrb.gmra.mxu0 %v2323_v51  ;;  %2428 = vmatmul.f32.vlgmr.msra.gmra.mxu1 %v2324_v52 }
 0x5cd   : > { %v2300_v54 = vpop.f32.mrf.mxu3  ;;  %v2320_v55 = vpop.f32.mrf.mxu2 }
 0x5ce   : > { %v2301_v56 = vadd.f32 %v2300_v54, %v2234_v13  ;;  %v2321_v17 = vadd.f32 %v2320_v55, %v2235_v53 }
 0x5d0   : > { %v2325_v57 = vmax.f32 %v2301_v56, 0.0  ;;  %v2326_v58 = vmax.f32 %v2321_v17, 0.0 }
 0x5d2   : > { %2448 = vmatmul.f32.vlgmr.msra.gmra.mxu3 %v2325_v57  ;;  %2468 = vmatmul.f32.vlgmr.msrb.gmra.mxu2 %v2326_v58 }
 0x648   : > { %v2409_v60 = vpop.f32.mrf.mxu0  ;;  %v2429_v62 = vpop.f32.mrf.mxu1 }
 0x649   : > { %v2410_v61 = vadd.f32 %v2409_v60, %v2391_v59 }
 0x64b   : > { %v2430_v0 = vadd.f32 %v2429_v62, %v2410_v61 }
 0x655   : > { %v2449_v1 = vpop.f32.mrf.mxu3  ;;  %v2469_v3 = vpop.f32.mrf.mxu2 }
 0x656   : > { %v2450_v2 = vadd.f32 %v2449_v1, %v2430_v0 }
 0x658   : > { %v2470_v4 = vadd.f32 %v2469_v3, %v2450_v2 }
 0x65a   : > { %v2473_v5 = vsel %vm2472_vm4, %v2470_v4, -inf }
 0x65b   : > { %2474 = vmax.xlane.f32.xlu0 %v2473_v5 }
 0x6ce   : > { %v2475_v6 = vpop.xlane.xlu0 %2474 }
 0x6cf   : > { %v2476_v7 = vsub.f32 %v2470_v4, %v2475_v6 }
 0x6d1   : > { %v2477_v8 = vmul.f32 1.442695, %v2476_v7 }
 0x6d3   : > { %2873 = vpow2.f32 %v2477_v8 }
 0x6d9   : > { %v2874_v9 = vpop.eup %2873 }
 0x6da   : > { %v2479_v10 = vsel %vm2472_vm4, %v2874_v9, 0.0 }
 0x6db   : > { %2480 = vadd.xlane.f32.xlu0 %v2479_v10 }
 0x74e   : > { %v2481_v11 = vpop.xlane.xlu0 %2480 }
 0x74f   : > { %2875 = vrcp.f32 %v2481_v11  ;;  %v2493_v16 = vand.u32 2147483648, %v2481_v11  ;;  %v2491_v19 = vand.u32 2147483647, %v2481_v11  ;;  %vm2487_vm6 = vweird.f32 %v2481_v11 }
 0x751   : > { %v2494_v63 = vor.u32 1.1754944e-38, %v2493_v16  ;;  %vm2492_vm8 = vcmp.eq.f32.partialorder %v2491_v19, 8.507059e+37 }
 0x755   : > { %v2876_v12 = vpop.eup %2875 }
 0x756   : > { %v2483_v14 = vmul.f32 %v2876_v12, %v2481_v11  ;;  %vm2488_vm5 = vweird.f32 %v2876_v12 }
 0x757   : > { %vm2489_vm7 = vmor %vm2487_vm6, %vm2488_vm5 }
 0x758   : > { %v2484_v15 = vsub.f32 1.0, %v2483_v14 }
 0x75a   : > { %v2485_v18 = vmul.f32 %v2876_v12, %v2484_v15 }
 0x75c   : > { %v2486_v20 = vadd.f32 %v2876_v12, %v2485_v18 }
 0x75e   : > { %v2490_v21 = vsel %vm2489_vm7, %v2876_v12, %v2486_v20 }
 0x75f   : > { %v2495_v22 = vsel %vm2492_vm8, %v2494_v63, %v2490_v21 }
 0x760   : > { %v2496_v23 = vmul.f32 %v2874_v9, %v2495_v22 }
 0x762   : > { %2497 = vst.msk [vmem:[%s432_s14] sm:$0x1] %vm2472_vm4, %v2496_v23 }
 0x763   : > { %2904 = shalt.err (!%p2901_p3)
}
 0x764   : > { %2832 = dma.vmem_to_hbm [thread:$0]  (%p3049_p5), %s2510_s30, 16, %s2512_s15, %s2499_s16  }
 0x765 PF: > { %p2838_p4 = scmp.ge.s32.totalorder %s2939_s28, 2  ;;  %s2523_s24 = sand.u32 1, %s2927_s25  }
 0x766   : > { %s2524_s14 = scalar_lea.sflag [#allocation3], %s2523_s24 }
 0x767   : > { %p2835_p7 = pnand %p2838_p4, %p3053_p6 }
 0x769   : > { %p2836_p8 = pneg %p2835_p7 }
 0x76b   : > { %2922 = dma.done.wait (%p2836_p8), %s2524_s14, 16  }
 0x76c   : > { %2924 = vsyncadd (%p2836_p8), %s2524_s14, 4294967280  ;;  %s4342_s28 = sld [smem:[#allocation6_spill]]  ;;  %s4345_s25 = smov %s2931_s26 }
 0x76d   : > { %s4343_s23 = sld [smem:[#allocation5_spill]] }
 0x76e   : > { %s4344_s27 = sld [smem:[#allocation7_spill]] }
 0x772   : > { %p23_p9 = scmp.ge.s32.totalorder %s4342_s28, 4  }
 0x773   : > { %s4346_s26 = smov %s4343_s23 }
 0x774   :  { %25 = sbr.rel (!%p23_p9) target bundleno = 3 (0x3), region = 153 }
 0x779   :  { %2529 = vsyncpa [#allocation3], 1 }
 0x77a   :  { %2531 = vsyncpa [#allocation3 + $0x1], 1 }

</bundles_post_ra>
